<compile_context>
chip_gen: v7x
topology: tpu7x:2x2x1
jax: 0.10.0
libtpu: 0.0.40
codegen_flags: <defaults>
</compile_context>

<pallas_src>
import functools

import jax
import jax.numpy as jnp
from jax.experimental import pallas as pl
from jax.experimental.pallas import tpu as pltpu


# --------------------------------------------------------------------------------------
# Kernel
# --------------------------------------------------------------------------------------
def _expansion_block2_kernel(
    x_ref,        # (bt, Cin, S_lo)    low-res input, spatial flattened, bf16
    p_ref,        # (bt, Cmid, S_hi)   passthrough, spatial flattened, f32
    up_ref,       # (S_lo, S_hi)       0/1 nearest-2x-upsample selection matrix, bf16
    mask_ref,     # (9, 1, S_hi)       3x3 tap validity masks (zero pad + no flat wrap), f32
    gmat_ref,     # (Cmid, Cmid)       0/1 group-membership matrix for GroupNorm, f32
    w1_ref,       # (Cmid, Cin)        decimate 1x1 conv, bf16
    g1_ref, b1_ref,            # (Cmid, 1) f32
    w2_ref,       # (Cmid, 9*Cmid)     process_passthrough im2col weights, bf16
    bias2_ref,    # (Cmid, 1) f32
    g2_ref, b2_ref,            # (Cmid, 1) f32
    w3_ref,       # (2Cmid, 9*2Cmid)   conjoin im2col weights (acts on stacked [x_up; p]), bf16
    w4_ref,       # (Cmid, 9*2Cmid)    reduce im2col weights, bf16
    g4_ref, b4_ref,            # (Cmid, 1) f32
    o_ref,        # (bt, Cmid, S_hi)   f32
    im_ref,       # scratch (9*2*Cmid, S_hi) bf16 — shared im2col buffer for all 3x3 convs
    *, cmid, s_lo, s_hi, wh, groups, eps, bt,
):
    f32 = jnp.float32
    bf16 = jnp.bfloat16
    gmat = gmat_ref[...]
    cs = cmid // groups

    def conv3x3(x_f32, w_im_ref, cin):
        """3x3 same-padding conv on the flattened plane: 8 XLU rolls + ONE K=9*cin matmul."""
        t = 0
        for dy in (-1, 0, 1):
            for dx in (-1, 0, 1):
                shift = dy * wh + dx
                if shift == 0:
                    xs = x_f32                                     # center tap: no roll, no mask
                else:
                    xs = pltpu.roll(x_f32, (-shift) % s_hi, axis=1) * mask_ref[t]
                im_ref[t * cin:(t + 1) * cin, :] = xs.astype(bf16)
                t += 1
        return jnp.dot(w_im_ref[...], im_ref[0:9 * cin, :],
                       preferred_element_type=f32)

    def gnorm(y, gamma_ref, beta_ref, n_elems):
        """GroupNorm: spatial reduce first, tiny group-mix matmuls, two-pass (centered) variance."""
        inv_n = 1.0 / float(n_elems)
        sy = jnp.sum(y, axis=1, keepdims=True)                         # (C, 1)
        mean = jnp.dot(gmat, sy, preferred_element_type=f32) * inv_n   # per-channel group mean
        d = y - mean
        sq = jnp.sum(d * d, axis=1, keepdims=True)                     # (C, 1)
        var = jnp.dot(gmat, sq, preferred_element_type=f32) * inv_n
        inv = jax.lax.rsqrt(var + eps)
        return d * inv * gamma_ref[...] + beta_ref[...]

    def silu(v):
        # divide -> approx EUP reciprocal (VPU slot savings; exp already on EUP)
        return v * pl.reciprocal(1.0 + jnp.exp(-v), approx=True)

    for s in range(bt):
        x = x_ref[s]                           # (Cin, S_lo) bf16
        pt = p_ref[s].astype(f32)              # (Cmid, S_hi)

        # ---- decimate: 1x1 conv (no bias) + GroupNorm at LOW resolution (exact for
        # nearest-2x: the 1x1 conv commutes with duplication and GN stats are invariant),
        # then nearest-2x upsample as a matmul with the 0/1 selection matrix.
        y = jnp.dot(w1_ref[...], x, preferred_element_type=f32)        # (Cmid, S_lo)
        y = gnorm(y, g1_ref, b1_ref, cs * s_lo)
        x_up = jnp.dot(y.astype(bf16), up_ref[...],
                       preferred_element_type=f32)                     # (Cmid, S_hi)

        # ---- process_passthrough: 3x3 conv + bias + GroupNorm.
        p = conv3x3(pt, w2_ref, cmid) + bias2_ref[...]
        p = gnorm(p, g2_ref, b2_ref, cs * s_hi)

        # ---- conjoin: one 3x3 conv over the stacked [x_up; p] plane; SiLU.
        z = jnp.concatenate([x_up, p], axis=0)                         # (2*Cmid, S_hi)
        c = silu(conv3x3(z, w3_ref, 2 * cmid))

        # ---- reduce: 3x3 conv (2*Cmid -> Cmid) + GroupNorm + SiLU.
        r = conv3x3(c, w4_ref, 2 * cmid)
        r = gnorm(r, g4_ref, b4_ref, cs * s_hi)
        r = silu(r)

        o_ref[s] = r.astype(o_ref.dtype)


# --------------------------------------------------------------------------------------
# Wrapper
# --------------------------------------------------------------------------------------
@functools.partial(jax.jit, static_argnames=("batch_block",))
def expansion_block2_forward(inp, passthrough, params, batch_block=1):
    """Pallas TPU implementation of ExpansionBlock2.forward (NCHW).

    batch_block > 1 amortizes per-grid-step overhead on single-TC chips (v5e/v6e); keep 1 to
    let v7x spread the batch over both TensorCores via the 'parallel' grid axis.
    """
    B, Cin, H, W = inp.shape
    Bp, Cmid, Hh, Wh = passthrough.shape
    assert B == Bp and Hh == 2 * H and Wh == 2 * W
    groups = 8
    assert Cmid % groups == 0
    bt = batch_block
    assert B % bt == 0
    S_lo, S_hi = H * W, Hh * Wh
    f32, bf16 = jnp.float32, jnp.bfloat16

    # Lane-dense flattened-spatial views (free metadata reshapes in NCHW).
    # x only feeds the 1x1-conv matmul -> cast to bf16 wrapper-side (halves its DMA bytes).
    x_flat = inp.reshape(B, Cin, S_lo).astype(bf16)
    p_flat = passthrough.reshape(B, Cmid, S_hi).astype(f32)

    # Nearest-2x upsample selection matrix: up[a*W+b, i*Wh+j] = 1 iff a==i//2 and b==j//2.
    ii = jnp.arange(S_hi, dtype=jnp.int32) // Wh
    jj = jnp.arange(S_hi, dtype=jnp.int32) % Wh
    src = (ii // 2) * W + (jj // 2)
    up = (src[None, :] == jnp.arange(S_lo, dtype=jnp.int32)[:, None]).astype(bf16)

    # 3x3 tap validity masks over the flattened hi-res plane, t = (dy+1)*3 + (dx+1).
    mask_list = []
    for dy in (-1, 0, 1):
        for dx in (-1, 0, 1):
            ok = (ii + dy >= 0) & (ii + dy < Hh) & (jj + dx >= 0) & (jj + dx < Wh)
            mask_list.append(ok)
    masks = jnp.stack(mask_list).astype(f32).reshape(9, 1, S_hi)

    # GroupNorm group-membership matrix (contiguous channel groups, PyTorch semantics).
    cs = Cmid // groups
    cidx = jnp.arange(Cmid, dtype=jnp.int32)
    gmat = ((cidx[:, None] // cs) == (cidx[None, :] // cs)).astype(f32)

    def im2col_w(w):
        # (Cout, Cin, 3, 3) -> (Cout, 9*Cin); column block t = ky*3+kx holds the Cin channels.
        co, ci = w.shape[0], w.shape[1]
        return jnp.transpose(w, (0, 2, 3, 1)).reshape(co, 9 * ci).astype(bf16)

    w1 = params["w1"].reshape(Cmid, Cin).astype(bf16)
    g1 = params["g1"].reshape(Cmid, 1).astype(f32)
    b1 = params["b1"].reshape(Cmid, 1).astype(f32)
    w2 = im2col_w(params["w2"])
    bias2 = params["bias2"].reshape(Cmid, 1).astype(f32)
    g2 = params["g2"].reshape(Cmid, 1).astype(f32)
    b2 = params["b2"].reshape(Cmid, 1).astype(f32)
    w3 = im2col_w(params["w3"])        # acts on the stacked [x_up; p] (same order as torch.cat)
    w4 = im2col_w(params["w4"])
    g4 = params["g4"].reshape(Cmid, 1).astype(f32)
    b4 = params["b4"].reshape(Cmid, 1).astype(f32)

    kernel = functools.partial(
        _expansion_block2_kernel,
        cmid=Cmid, s_lo=S_lo, s_hi=S_hi, wh=Wh, groups=groups, eps=1e-5, bt=bt,
    )

    def full(shape):
        zeros = (0,) * len(shape)
        return pl.BlockSpec(shape, lambda b, _z=zeros: _z)

    out_flat = pl.pallas_call(
        kernel,
        out_shape=jax.ShapeDtypeStruct((B, Cmid, S_hi), f32),
        grid_spec=pltpu.PrefetchScalarGridSpec(
            num_scalar_prefetch=0,
            grid=(B // bt,),
            in_specs=[
                pl.BlockSpec((bt, Cin, S_lo), lambda b: (b, 0, 0)),
                pl.BlockSpec((bt, Cmid, S_hi), lambda b: (b, 0, 0)),
                full(up.shape),
                full(masks.shape),
                full(gmat.shape),
                full(w1.shape),
                full(g1.shape),
                full(b1.shape),
                full(w2.shape),
                full(bias2.shape),
                full(g2.shape),
                full(b2.shape),
                full(w3.shape),
                full(w4.shape),
                full(g4.shape),
                full(b4.shape),
            ],
            out_specs=pl.BlockSpec((bt, Cmid, S_hi), lambda b: (b, 0, 0)),
            scratch_shapes=[pltpu.VMEM((9 * 2 * Cmid, S_hi), bf16)],
        ),
        compiler_params=pltpu.CompilerParams(
            dimension_semantics=("parallel",),
        ),
    )(x_flat, p_flat, up, masks, gmat, w1, g1, b1, w2, bias2, g2, b2, w3, w4, g4, b4)

    return out_flat.reshape(B, Cmid, Hh, Wh)


# --------------------------------------------------------------------------------------
# Pure-JAX reference (mirrors the PyTorch module exactly)
# --------------------------------------------------------------------------------------
def _conv2d_ref(x, w, bias=None, pad=1):
    out = jax.lax.conv_general_dilated(
        x, w, window_strides=(1, 1),
        padding=[(pad, pad), (pad, pad)],
        dimension_numbers=("NCHW", "OIHW", "NCHW"),
        precision=jax.lax.Precision.HIGHEST,
    )
    if bias is not None:
        out = out + bias.reshape(1, -1, 1, 1)
    return out


def _group_norm_ref(x, gamma, beta, groups=8, eps=1e-5):
    b, c, h, w = x.shape
    xg = x.reshape(b, groups, c // groups, h, w)
    mean = jnp.mean(xg, axis=(2, 3, 4), keepdims=True)
    var = jnp.mean((xg - mean) ** 2, axis=(2, 3, 4), keepdims=True)
    xn = ((xg - mean) / jnp.sqrt(var + eps)).reshape(b, c, h, w)
    return xn * gamma.reshape(1, -1, 1, 1) + beta.reshape(1, -1, 1, 1)


def _silu_ref(x):
    return x * jax.nn.sigmoid(x)


def expansion_block2_ref(inp, passthrough, p):
    x = jnp.repeat(jnp.repeat(inp, 2, axis=2), 2, axis=3)              # nearest 2x
    x = _group_norm_ref(_conv2d_ref(x, p["w1"], None, pad=0), p["g1"], p["b1"])
    pt = _group_norm_ref(_conv2d_ref(passthrough, p["w2"], p["bias2"], pad=1),
                         p["g2"], p["b2"])
    c = _silu_ref(_conv2d_ref(jnp.concatenate([x, pt], axis=1), p["w3"], None, pad=1))
    r = _group_norm_ref(_conv2d_ref(c, p["w4"], None, pad=1), p["g4"], p["b4"])
    return _silu_ref(r)


# --------------------------------------------------------------------------------------
# Demo / self-check
# --------------------------------------------------------------------------------------
if __name__ == "__main__":
    key = jax.random.PRNGKey(0)
    B, Cin, H, W = 2, 16, 8, 8          # filters_in = 16
    Cmid = Cin // 2                     # filters_out = filters_in // 2 = 8 (divisible by 8 groups)
    Hh, Wh = 2 * H, 2 * W

    ks = jax.random.split(key, 16)
    inp = jax.random.normal(ks[0], (B, Cin, H, W), jnp.float32)
    passthrough = jax.random.normal(ks[1], (B, Cmid, Hh, Wh), jnp.float32)

    def nrm(k, shape, scale):
        return scale * jax.random.normal(k, shape, jnp.float32)

    params = {
        "w1": nrm(ks[2], (Cmid, Cin, 1, 1), 0.3),
        "g1": 1.0 + nrm(ks[3], (Cmid,), 0.1),
        "b1": nrm(ks[4], (Cmid,), 0.1),
        "w2": nrm(ks[5], (Cmid, Cmid, 3, 3), 0.2),
        "bias2": nrm(ks[6], (Cmid,), 0.1),
        "g2": 1.0 + nrm(ks[7], (Cmid,), 0.1),
        "b2": nrm(ks[8], (Cmid,), 0.1),
        "w3": nrm(ks[9], (2 * Cmid, 2 * Cmid, 3, 3), 0.15),
        "w4": nrm(ks[10], (Cmid, 2 * Cmid, 3, 3), 0.15),
        "g4": 1.0 + nrm(ks[11], (Cmid,), 0.1),
        "b4": nrm(ks[12], (Cmid,), 0.1),
    }

    out = expansion_block2_forward(inp, passthrough, params, batch_block=1)
    out = jax.block_until_ready(out)
    assert out.shape == (B, Cmid, Hh, Wh), out.shape
    assert out.dtype == jnp.float32

    ref = expansion_block2_ref(inp, passthrough, params)
    err = float(jnp.max(jnp.abs(out - ref)))
    # bf16 MXU operands + approx-reciprocal SiLU vs. an f32 HIGHEST-precision reference.
    assert err < 5e-2, f"max abs err vs reference: {err}"

    print("KERNEL_OK")
</pallas_src>

<mosaic_0001>
module attributes {stable_mosaic.version = 11 : i64} {
  func.func @_expansion_block2_kernel(%arg0: i32, %arg1: memref<1x16x64xbf16, #tpu.memory_space<vmem>>, %arg2: memref<1x8x256xf32, #tpu.memory_space<vmem>>, %arg3: memref<64x256xbf16, #tpu.memory_space<vmem>>, %arg4: memref<9x1x256xf32, #tpu.memory_space<vmem>>, %arg5: memref<8x8xf32, #tpu.memory_space<vmem>>, %arg6: memref<8x16xbf16, #tpu.memory_space<vmem>>, %arg7: memref<8x1xf32, #tpu.memory_space<vmem>>, %arg8: memref<8x1xf32, #tpu.memory_space<vmem>>, %arg9: memref<8x72xbf16, #tpu.memory_space<vmem>>, %arg10: memref<8x1xf32, #tpu.memory_space<vmem>>, %arg11: memref<8x1xf32, #tpu.memory_space<vmem>>, %arg12: memref<8x1xf32, #tpu.memory_space<vmem>>, %arg13: memref<16x144xbf16, #tpu.memory_space<vmem>>, %arg14: memref<8x144xbf16, #tpu.memory_space<vmem>>, %arg15: memref<8x1xf32, #tpu.memory_space<vmem>>, %arg16: memref<8x1xf32, #tpu.memory_space<vmem>>, %arg17: memref<1x8x256xf32, #tpu.memory_space<vmem>>, %arg18: memref<144x256xbf16, #tpu.memory_space<vmem>>) attributes {dimension_semantics = [#tpu.dimension_semantics<parallel>], iteration_bounds = array<i64: 2>, scalar_prefetch = 0 : i64, scratch_operands = 1 : i64, tpu.core_type = #tpu.core_type<tc>, window_params = [{transform_indices = @transform_0, window_bounds = array<i64: 1, 16, 64>}, {transform_indices = @transform_1, window_bounds = array<i64: 1, 8, 256>}, {pipeline_mode = #tpu.pipeline_mode<synchronous>, transform_indices = @transform_2, window_bounds = array<i64: 64, 256>}, {pipeline_mode = #tpu.pipeline_mode<synchronous>, transform_indices = @transform_3, window_bounds = array<i64: 9, 1, 256>}, {pipeline_mode = #tpu.pipeline_mode<synchronous>, transform_indices = @transform_4, window_bounds = array<i64: 8, 8>}, {pipeline_mode = #tpu.pipeline_mode<synchronous>, transform_indices = @transform_5, window_bounds = array<i64: 8, 16>}, {pipeline_mode = #tpu.pipeline_mode<synchronous>, transform_indices = @transform_6, window_bounds = array<i64: 8, 1>}, {pipeline_mode = #tpu.pipeline_mode<synchronous>, transform_indices = @transform_7, window_bounds = array<i64: 8, 1>}, {pipeline_mode = #tpu.pipeline_mode<synchronous>, transform_indices = @transform_8, window_bounds = array<i64: 8, 72>}, {pipeline_mode = #tpu.pipeline_mode<synchronous>, transform_indices = @transform_9, window_bounds = array<i64: 8, 1>}, {pipeline_mode = #tpu.pipeline_mode<synchronous>, transform_indices = @transform_10, window_bounds = array<i64: 8, 1>}, {pipeline_mode = #tpu.pipeline_mode<synchronous>, transform_indices = @transform_11, window_bounds = array<i64: 8, 1>}, {pipeline_mode = #tpu.pipeline_mode<synchronous>, transform_indices = @transform_12, window_bounds = array<i64: 16, 144>}, {pipeline_mode = #tpu.pipeline_mode<synchronous>, transform_indices = @transform_13, window_bounds = array<i64: 8, 144>}, {pipeline_mode = #tpu.pipeline_mode<synchronous>, transform_indices = @transform_14, window_bounds = array<i64: 8, 1>}, {pipeline_mode = #tpu.pipeline_mode<synchronous>, transform_indices = @transform_15, window_bounds = array<i64: 8, 1>}, {transform_indices = @transform_16, window_bounds = array<i64: 1, 8, 256>}]} {
    %c0 = arith.constant 0 : index
    %c0_0 = arith.constant 0 : index
    %0 = vector.load %arg5[%c0, %c0_0] : memref<8x8xf32, #tpu.memory_space<vmem>>, vector<8x8xf32>
    %c0_1 = arith.constant 0 : index
    %c0_2 = arith.constant 0 : index
    %c0_3 = arith.constant 0 : index
    %1 = vector.load %arg1[%c0_1, %c0_2, %c0_3] : memref<1x16x64xbf16, #tpu.memory_space<vmem>>, vector<1x16x64xbf16>
    %2 = vector.shape_cast %1 : vector<1x16x64xbf16> to vector<16x64xbf16>
    %c0_4 = arith.constant 0 : index
    %c0_5 = arith.constant 0 : index
    %c0_6 = arith.constant 0 : index
    %3 = vector.load %arg2[%c0_4, %c0_5, %c0_6] : memref<1x8x256xf32, #tpu.memory_space<vmem>>, vector<1x8x256xf32>
    %4 = vector.shape_cast %3 : vector<1x8x256xf32> to vector<8x256xf32>
    %c0_7 = arith.constant 0 : index
    %c0_8 = arith.constant 0 : index
    %5 = vector.load %arg6[%c0_7, %c0_8] : memref<8x16xbf16, #tpu.memory_space<vmem>>, vector<8x16xbf16>
    %cst = arith.constant dense<0.000000e+00> : vector<8x64xf32>
    %6 = tpu.matmul %5, %2, %cst {dimension_numbers = #tpu.dot_dimension_numbers<[1], [0], [0], [1], [0, 0, 1, 1], [], []>} : vector<8x16xbf16>, vector<16x64xbf16>, vector<8x64xf32> -> vector<8x64xf32>
    %cst_9 = arith.constant dense<0.000000e+00> : vector<8xf32>
    %7 = vector.multi_reduction <add>, %6, %cst_9 [1] : vector<8x64xf32> to vector<8xf32>
    %8 = vector.shape_cast %7 : vector<8xf32> to vector<8x1xf32>
    %cst_10 = arith.constant dense<0.000000e+00> : vector<8x1xf32>
    %9 = tpu.matmul %0, %8, %cst_10 {dimension_numbers = #tpu.dot_dimension_numbers<[1], [0], [0], [1], [0, 0, 1, 1], [], []>} : vector<8x8xf32>, vector<8x1xf32>, vector<8x1xf32> -> vector<8x1xf32>
    %cst_11 = arith.constant 1.562500e-02 : f32
    %10 = vector.broadcast %cst_11 : f32 to vector<8x1xf32>
    %11 = arith.mulf %9, %10 : vector<8x1xf32>
    %12 = vector.broadcast %11 : vector<8x1xf32> to vector<8x64xf32>
    %13 = arith.subf %6, %12 : vector<8x64xf32>
    %14 = arith.mulf %13, %13 : vector<8x64xf32>
    %cst_12 = arith.constant dense<0.000000e+00> : vector<8xf32>
    %15 = vector.multi_reduction <add>, %14, %cst_12 [1] : vector<8x64xf32> to vector<8xf32>
    %16 = vector.shape_cast %15 : vector<8xf32> to vector<8x1xf32>
    %cst_13 = arith.constant dense<0.000000e+00> : vector<8x1xf32>
    %17 = tpu.matmul %0, %16, %cst_13 {dimension_numbers = #tpu.dot_dimension_numbers<[1], [0], [0], [1], [0, 0, 1, 1], [], []>} : vector<8x8xf32>, vector<8x1xf32>, vector<8x1xf32> -> vector<8x1xf32>
    %cst_14 = arith.constant 1.562500e-02 : f32
    %18 = vector.broadcast %cst_14 : f32 to vector<8x1xf32>
    %19 = arith.mulf %17, %18 : vector<8x1xf32>
    %cst_15 = arith.constant 9.99999974E-6 : f32
    %20 = vector.broadcast %cst_15 : f32 to vector<8x1xf32>
    %21 = arith.addf %19, %20 : vector<8x1xf32>
    %22 = math.rsqrt %21 : vector<8x1xf32>
    %23 = vector.broadcast %22 : vector<8x1xf32> to vector<8x64xf32>
    %24 = arith.mulf %13, %23 : vector<8x64xf32>
    %c0_16 = arith.constant 0 : index
    %c0_17 = arith.constant 0 : index
    %25 = vector.load %arg7[%c0_16, %c0_17] : memref<8x1xf32, #tpu.memory_space<vmem>>, vector<8x1xf32>
    %26 = vector.broadcast %25 : vector<8x1xf32> to vector<8x64xf32>
    %27 = arith.mulf %24, %26 : vector<8x64xf32>
    %c0_18 = arith.constant 0 : index
    %c0_19 = arith.constant 0 : index
    %28 = vector.load %arg8[%c0_18, %c0_19] : memref<8x1xf32, #tpu.memory_space<vmem>>, vector<8x1xf32>
    %29 = vector.broadcast %28 : vector<8x1xf32> to vector<8x64xf32>
    %30 = arith.addf %27, %29 : vector<8x64xf32>
    %31 = arith.truncf %30 : vector<8x64xf32> to vector<8x64xbf16>
    %c0_20 = arith.constant 0 : index
    %c0_21 = arith.constant 0 : index
    %32 = vector.load %arg3[%c0_20, %c0_21] : memref<64x256xbf16, #tpu.memory_space<vmem>>, vector<64x256xbf16>
    %cst_22 = arith.constant dense<0.000000e+00> : vector<8x256xf32>
    %33 = tpu.matmul %31, %32, %cst_22 {dimension_numbers = #tpu.dot_dimension_numbers<[1], [0], [0], [1], [0, 0, 1, 1], [], []>} : vector<8x64xbf16>, vector<64x256xbf16>, vector<8x256xf32> -> vector<8x256xf32>
    %c17_i32 = arith.constant 17 : i32
    %34 = tpu.dynamic_rotate %4 by %c17_i32 dim 1 : vector<8x256xf32>, i32 -> vector<8x256xf32>
    %c0_23 = arith.constant 0 : index
    %c0_24 = arith.constant 0 : index
    %c0_25 = arith.constant 0 : index
    %35 = vector.load %arg4[%c0_23, %c0_24, %c0_25] : memref<9x1x256xf32, #tpu.memory_space<vmem>>, vector<1x1x256xf32>
    %36 = vector.shape_cast %35 : vector<1x1x256xf32> to vector<1x256xf32>
    %37 = vector.broadcast %36 : vector<1x256xf32> to vector<8x256xf32>
    %38 = arith.mulf %34, %37 : vector<8x256xf32>
    %39 = arith.truncf %38 : vector<8x256xf32> to vector<8x256xbf16>
    %c0_26 = arith.constant 0 : index
    %c0_27 = arith.constant 0 : index
    %40 = vector.load %arg18[%c0_26, %c0_27] : memref<144x256xbf16, #tpu.memory_space<vmem>>, vector<8x256xbf16>
    tpu.vector_store %arg18[%c0_26, %c0_27], %39 {strides = array<i32>} : memref<144x256xbf16, #tpu.memory_space<vmem>>, vector<8x256xbf16>,
    %c16_i32 = arith.constant 16 : i32
    %41 = tpu.dynamic_rotate %4 by %c16_i32 dim 1 : vector<8x256xf32>, i32 -> vector<8x256xf32>
    %c1 = arith.constant 1 : index
    %c0_28 = arith.constant 0 : index
    %c0_29 = arith.constant 0 : index
    %42 = vector.load %arg4[%c1, %c0_28, %c0_29] : memref<9x1x256xf32, #tpu.memory_space<vmem>>, vector<1x1x256xf32>
    %43 = vector.shape_cast %42 : vector<1x1x256xf32> to vector<1x256xf32>
    %44 = vector.broadcast %43 : vector<1x256xf32> to vector<8x256xf32>
    %45 = arith.mulf %41, %44 : vector<8x256xf32>
    %46 = arith.truncf %45 : vector<8x256xf32> to vector<8x256xbf16>
    %c8 = arith.constant 8 : index
    %c0_30 = arith.constant 0 : index
    %47 = vector.load %arg18[%c8, %c0_30] : memref<144x256xbf16, #tpu.memory_space<vmem>>, vector<8x256xbf16>
    tpu.vector_store %arg18[%c8, %c0_30], %46 {strides = array<i32>} : memref<144x256xbf16, #tpu.memory_space<vmem>>, vector<8x256xbf16>,
    %c15_i32 = arith.constant 15 : i32
    %48 = tpu.dynamic_rotate %4 by %c15_i32 dim 1 : vector<8x256xf32>, i32 -> vector<8x256xf32>
    %c2 = arith.constant 2 : index
    %c0_31 = arith.constant 0 : index
    %c0_32 = arith.constant 0 : index
    %49 = vector.load %arg4[%c2, %c0_31, %c0_32] : memref<9x1x256xf32, #tpu.memory_space<vmem>>, vector<1x1x256xf32>
    %50 = vector.shape_cast %49 : vector<1x1x256xf32> to vector<1x256xf32>
    %51 = vector.broadcast %50 : vector<1x256xf32> to vector<8x256xf32>
    %52 = arith.mulf %48, %51 : vector<8x256xf32>
    %53 = arith.truncf %52 : vector<8x256xf32> to vector<8x256xbf16>
    %c16 = arith.constant 16 : index
    %c0_33 = arith.constant 0 : index
    %54 = vector.load %arg18[%c16, %c0_33] : memref<144x256xbf16, #tpu.memory_space<vmem>>, vector<8x256xbf16>
    tpu.vector_store %arg18[%c16, %c0_33], %53 {strides = array<i32>} : memref<144x256xbf16, #tpu.memory_space<vmem>>, vector<8x256xbf16>,
    %c1_i32 = arith.constant 1 : i32
    %55 = tpu.dynamic_rotate %4 by %c1_i32 dim 1 : vector<8x256xf32>, i32 -> vector<8x256xf32>
    %c3 = arith.constant 3 : index
    %c0_34 = arith.constant 0 : index
    %c0_35 = arith.constant 0 : index
    %56 = vector.load %arg4[%c3, %c0_34, %c0_35] : memref<9x1x256xf32, #tpu.memory_space<vmem>>, vector<1x1x256xf32>
    %57 = vector.shape_cast %56 : vector<1x1x256xf32> to vector<1x256xf32>
    %58 = vector.broadcast %57 : vector<1x256xf32> to vector<8x256xf32>
    %59 = arith.mulf %55, %58 : vector<8x256xf32>
    %60 = arith.truncf %59 : vector<8x256xf32> to vector<8x256xbf16>
    %c24 = arith.constant 24 : index
    %c0_36 = arith.constant 0 : index
    %61 = vector.load %arg18[%c24, %c0_36] : memref<144x256xbf16, #tpu.memory_space<vmem>>, vector<8x256xbf16>
    tpu.vector_store %arg18[%c24, %c0_36], %60 {strides = array<i32>} : memref<144x256xbf16, #tpu.memory_space<vmem>>, vector<8x256xbf16>,
    %62 = arith.truncf %4 : vector<8x256xf32> to vector<8x256xbf16>
    %c32 = arith.constant 32 : index
    %c0_37 = arith.constant 0 : index
    %63 = vector.load %arg18[%c32, %c0_37] : memref<144x256xbf16, #tpu.memory_space<vmem>>, vector<8x256xbf16>
    tpu.vector_store %arg18[%c32, %c0_37], %62 {strides = array<i32>} : memref<144x256xbf16, #tpu.memory_space<vmem>>, vector<8x256xbf16>,
    %c255_i32 = arith.constant 255 : i32
    %64 = tpu.dynamic_rotate %4 by %c255_i32 dim 1 : vector<8x256xf32>, i32 -> vector<8x256xf32>
    %c5 = arith.constant 5 : index
    %c0_38 = arith.constant 0 : index
    %c0_39 = arith.constant 0 : index
    %65 = vector.load %arg4[%c5, %c0_38, %c0_39] : memref<9x1x256xf32, #tpu.memory_space<vmem>>, vector<1x1x256xf32>
    %66 = vector.shape_cast %65 : vector<1x1x256xf32> to vector<1x256xf32>
    %67 = vector.broadcast %66 : vector<1x256xf32> to vector<8x256xf32>
    %68 = arith.mulf %64, %67 : vector<8x256xf32>
    %69 = arith.truncf %68 : vector<8x256xf32> to vector<8x256xbf16>
    %c40 = arith.constant 40 : index
    %c0_40 = arith.constant 0 : index
    %70 = vector.load %arg18[%c40, %c0_40] : memref<144x256xbf16, #tpu.memory_space<vmem>>, vector<8x256xbf16>
    tpu.vector_store %arg18[%c40, %c0_40], %69 {strides = array<i32>} : memref<144x256xbf16, #tpu.memory_space<vmem>>, vector<8x256xbf16>,
    %c241_i32 = arith.constant 241 : i32
    %71 = tpu.dynamic_rotate %4 by %c241_i32 dim 1 : vector<8x256xf32>, i32 -> vector<8x256xf32>
    %c6 = arith.constant 6 : index
    %c0_41 = arith.constant 0 : index
    %c0_42 = arith.constant 0 : index
    %72 = vector.load %arg4[%c6, %c0_41, %c0_42] : memref<9x1x256xf32, #tpu.memory_space<vmem>>, vector<1x1x256xf32>
    %73 = vector.shape_cast %72 : vector<1x1x256xf32> to vector<1x256xf32>
    %74 = vector.broadcast %73 : vector<1x256xf32> to vector<8x256xf32>
    %75 = arith.mulf %71, %74 : vector<8x256xf32>
    %76 = arith.truncf %75 : vector<8x256xf32> to vector<8x256xbf16>
    %c48 = arith.constant 48 : index
    %c0_43 = arith.constant 0 : index
    %77 = vector.load %arg18[%c48, %c0_43] : memref<144x256xbf16, #tpu.memory_space<vmem>>, vector<8x256xbf16>
    tpu.vector_store %arg18[%c48, %c0_43], %76 {strides = array<i32>} : memref<144x256xbf16, #tpu.memory_space<vmem>>, vector<8x256xbf16>,
    %c240_i32 = arith.constant 240 : i32
    %78 = tpu.dynamic_rotate %4 by %c240_i32 dim 1 : vector<8x256xf32>, i32 -> vector<8x256xf32>
    %c7 = arith.constant 7 : index
    %c0_44 = arith.constant 0 : index
    %c0_45 = arith.constant 0 : index
    %79 = vector.load %arg4[%c7, %c0_44, %c0_45] : memref<9x1x256xf32, #tpu.memory_space<vmem>>, vector<1x1x256xf32>
    %80 = vector.shape_cast %79 : vector<1x1x256xf32> to vector<1x256xf32>
    %81 = vector.broadcast %80 : vector<1x256xf32> to vector<8x256xf32>
    %82 = arith.mulf %78, %81 : vector<8x256xf32>
    %83 = arith.truncf %82 : vector<8x256xf32> to vector<8x256xbf16>
    %c56 = arith.constant 56 : index
    %c0_46 = arith.constant 0 : index
    %84 = vector.load %arg18[%c56, %c0_46] : memref<144x256xbf16, #tpu.memory_space<vmem>>, vector<8x256xbf16>
    tpu.vector_store %arg18[%c56, %c0_46], %83 {strides = array<i32>} : memref<144x256xbf16, #tpu.memory_space<vmem>>, vector<8x256xbf16>,
    %c239_i32 = arith.constant 239 : i32
    %85 = tpu.dynamic_rotate %4 by %c239_i32 dim 1 : vector<8x256xf32>, i32 -> vector<8x256xf32>
    %c8_47 = arith.constant 8 : index
    %c0_48 = arith.constant 0 : index
    %c0_49 = arith.constant 0 : index
    %86 = vector.load %arg4[%c8_47, %c0_48, %c0_49] : memref<9x1x256xf32, #tpu.memory_space<vmem>>, vector<1x1x256xf32>
    %87 = vector.shape_cast %86 : vector<1x1x256xf32> to vector<1x256xf32>
    %88 = vector.broadcast %87 : vector<1x256xf32> to vector<8x256xf32>
    %89 = arith.mulf %85, %88 : vector<8x256xf32>
    %90 = arith.truncf %89 : vector<8x256xf32> to vector<8x256xbf16>
    %c64 = arith.constant 64 : index
    %c0_50 = arith.constant 0 : index
    %91 = vector.load %arg18[%c64, %c0_50] : memref<144x256xbf16, #tpu.memory_space<vmem>>, vector<8x256xbf16>
    tpu.vector_store %arg18[%c64, %c0_50], %90 {strides = array<i32>} : memref<144x256xbf16, #tpu.memory_space<vmem>>, vector<8x256xbf16>,
    %c0_51 = arith.constant 0 : index
    %c0_52 = arith.constant 0 : index
    %92 = vector.load %arg9[%c0_51, %c0_52] : memref<8x72xbf16, #tpu.memory_space<vmem>>, vector<8x72xbf16>
    %c0_53 = arith.constant 0 : index
    %c0_54 = arith.constant 0 : index
    %93 = vector.load %arg18[%c0_53, %c0_54] : memref<144x256xbf16, #tpu.memory_space<vmem>>, vector<72x256xbf16>
    %cst_55 = arith.constant dense<0.000000e+00> : vector<8x256xf32>
    %94 = tpu.matmul %92, %93, %cst_55 {dimension_numbers = #tpu.dot_dimension_numbers<[1], [0], [0], [1], [0, 0, 1, 1], [], []>} : vector<8x72xbf16>, vector<72x256xbf16>, vector<8x256xf32> -> vector<8x256xf32>
    %c0_56 = arith.constant 0 : index
    %c0_57 = arith.constant 0 : index
    %95 = vector.load %arg10[%c0_56, %c0_57] : memref<8x1xf32, #tpu.memory_space<vmem>>, vector<8x1xf32>
    %96 = vector.broadcast %95 : vector<8x1xf32> to vector<8x256xf32>
    %97 = arith.addf %94, %96 : vector<8x256xf32>
    %cst_58 = arith.constant dense<0.000000e+00> : vector<8xf32>
    %98 = vector.multi_reduction <add>, %97, %cst_58 [1] : vector<8x256xf32> to vector<8xf32>
    %99 = vector.shape_cast %98 : vector<8xf32> to vector<8x1xf32>
    %cst_59 = arith.constant dense<0.000000e+00> : vector<8x1xf32>
    %100 = tpu.matmul %0, %99, %cst_59 {dimension_numbers = #tpu.dot_dimension_numbers<[1], [0], [0], [1], [0, 0, 1, 1], [], []>} : vector<8x8xf32>, vector<8x1xf32>, vector<8x1xf32> -> vector<8x1xf32>
    %cst_60 = arith.constant 3.906250e-03 : f32
    %101 = vector.broadcast %cst_60 : f32 to vector<8x1xf32>
    %102 = arith.mulf %100, %101 : vector<8x1xf32>
    %103 = vector.broadcast %102 : vector<8x1xf32> to vector<8x256xf32>
    %104 = arith.subf %97, %103 : vector<8x256xf32>
    %105 = arith.mulf %104, %104 : vector<8x256xf32>
    %cst_61 = arith.constant dense<0.000000e+00> : vector<8xf32>
    %106 = vector.multi_reduction <add>, %105, %cst_61 [1] : vector<8x256xf32> to vector<8xf32>
    %107 = vector.shape_cast %106 : vector<8xf32> to vector<8x1xf32>
    %cst_62 = arith.constant dense<0.000000e+00> : vector<8x1xf32>
    %108 = tpu.matmul %0, %107, %cst_62 {dimension_numbers = #tpu.dot_dimension_numbers<[1], [0], [0], [1], [0, 0, 1, 1], [], []>} : vector<8x8xf32>, vector<8x1xf32>, vector<8x1xf32> -> vector<8x1xf32>
    %cst_63 = arith.constant 3.906250e-03 : f32
    %109 = vector.broadcast %cst_63 : f32 to vector<8x1xf32>
    %110 = arith.mulf %108, %109 : vector<8x1xf32>
    %cst_64 = arith.constant 9.99999974E-6 : f32
    %111 = vector.broadcast %cst_64 : f32 to vector<8x1xf32>
    %112 = arith.addf %110, %111 : vector<8x1xf32>
    %113 = math.rsqrt %112 : vector<8x1xf32>
    %114 = vector.broadcast %113 : vector<8x1xf32> to vector<8x256xf32>
    %115 = arith.mulf %104, %114 : vector<8x256xf32>
    %c0_65 = arith.constant 0 : index
    %c0_66 = arith.constant 0 : index
    %116 = vector.load %arg11[%c0_65, %c0_66] : memref<8x1xf32, #tpu.memory_space<vmem>>, vector<8x1xf32>
    %117 = vector.broadcast %116 : vector<8x1xf32> to vector<8x256xf32>
    %118 = arith.mulf %115, %117 : vector<8x256xf32>
    %c0_67 = arith.constant 0 : index
    %c0_68 = arith.constant 0 : index
    %119 = vector.load %arg12[%c0_67, %c0_68] : memref<8x1xf32, #tpu.memory_space<vmem>>, vector<8x1xf32>
    %120 = vector.broadcast %119 : vector<8x1xf32> to vector<8x256xf32>
    %121 = arith.addf %118, %120 : vector<8x256xf32>
    %122 = tpu.concatenate %33, %121 in 0 : vector<8x256xf32>, vector<8x256xf32> -> vector<16x256xf32>
    %c17_i32_69 = arith.constant 17 : i32
    %123 = tpu.dynamic_rotate %122 by %c17_i32_69 dim 1 : vector<16x256xf32>, i32 -> vector<16x256xf32>
    %c0_70 = arith.constant 0 : index
    %c0_71 = arith.constant 0 : index
    %c0_72 = arith.constant 0 : index
    %124 = vector.load %arg4[%c0_70, %c0_71, %c0_72] : memref<9x1x256xf32, #tpu.memory_space<vmem>>, vector<1x1x256xf32>
    %125 = vector.shape_cast %124 : vector<1x1x256xf32> to vector<1x256xf32>
    %126 = vector.broadcast %125 : vector<1x256xf32> to vector<16x256xf32>
    %127 = arith.mulf %123, %126 : vector<16x256xf32>
    %128 = arith.truncf %127 : vector<16x256xf32> to vector<16x256xbf16>
    %c0_73 = arith.constant 0 : index
    %c0_74 = arith.constant 0 : index
    %129 = vector.load %arg18[%c0_73, %c0_74] : memref<144x256xbf16, #tpu.memory_space<vmem>>, vector<16x256xbf16>
    tpu.vector_store %arg18[%c0_73, %c0_74], %128 {strides = array<i32>} : memref<144x256xbf16, #tpu.memory_space<vmem>>, vector<16x256xbf16>,
    %c16_i32_75 = arith.constant 16 : i32
    %130 = tpu.dynamic_rotate %122 by %c16_i32_75 dim 1 : vector<16x256xf32>, i32 -> vector<16x256xf32>
    %c1_76 = arith.constant 1 : index
    %c0_77 = arith.constant 0 : index
    %c0_78 = arith.constant 0 : index
    %131 = vector.load %arg4[%c1_76, %c0_77, %c0_78] : memref<9x1x256xf32, #tpu.memory_space<vmem>>, vector<1x1x256xf32>
    %132 = vector.shape_cast %131 : vector<1x1x256xf32> to vector<1x256xf32>
    %133 = vector.broadcast %132 : vector<1x256xf32> to vector<16x256xf32>
    %134 = arith.mulf %130, %133 : vector<16x256xf32>
    %135 = arith.truncf %134 : vector<16x256xf32> to vector<16x256xbf16>
    %c16_79 = arith.constant 16 : index
    %c0_80 = arith.constant 0 : index
    %136 = vector.load %arg18[%c16_79, %c0_80] : memref<144x256xbf16, #tpu.memory_space<vmem>>, vector<16x256xbf16>
    tpu.vector_store %arg18[%c16_79, %c0_80], %135 {strides = array<i32>} : memref<144x256xbf16, #tpu.memory_space<vmem>>, vector<16x256xbf16>,
    %c15_i32_81 = arith.constant 15 : i32
    %137 = tpu.dynamic_rotate %122 by %c15_i32_81 dim 1 : vector<16x256xf32>, i32 -> vector<16x256xf32>
    %c2_82 = arith.constant 2 : index
    %c0_83 = arith.constant 0 : index
    %c0_84 = arith.constant 0 : index
    %138 = vector.load %arg4[%c2_82, %c0_83, %c0_84] : memref<9x1x256xf32, #tpu.memory_space<vmem>>, vector<1x1x256xf32>
    %139 = vector.shape_cast %138 : vector<1x1x256xf32> to vector<1x256xf32>
    %140 = vector.broadcast %139 : vector<1x256xf32> to vector<16x256xf32>
    %141 = arith.mulf %137, %140 : vector<16x256xf32>
    %142 = arith.truncf %141 : vector<16x256xf32> to vector<16x256xbf16>
    %c32_85 = arith.constant 32 : index
    %c0_86 = arith.constant 0 : index
    %143 = vector.load %arg18[%c32_85, %c0_86] : memref<144x256xbf16, #tpu.memory_space<vmem>>, vector<16x256xbf16>
    tpu.vector_store %arg18[%c32_85, %c0_86], %142 {strides = array<i32>} : memref<144x256xbf16, #tpu.memory_space<vmem>>, vector<16x256xbf16>,
    %c1_i32_87 = arith.constant 1 : i32
    %144 = tpu.dynamic_rotate %122 by %c1_i32_87 dim 1 : vector<16x256xf32>, i32 -> vector<16x256xf32>
    %c3_88 = arith.constant 3 : index
    %c0_89 = arith.constant 0 : index
    %c0_90 = arith.constant 0 : index
    %145 = vector.load %arg4[%c3_88, %c0_89, %c0_90] : memref<9x1x256xf32, #tpu.memory_space<vmem>>, vector<1x1x256xf32>
    %146 = vector.shape_cast %145 : vector<1x1x256xf32> to vector<1x256xf32>
    %147 = vector.broadcast %146 : vector<1x256xf32> to vector<16x256xf32>
    %148 = arith.mulf %144, %147 : vector<16x256xf32>
    %149 = arith.truncf %148 : vector<16x256xf32> to vector<16x256xbf16>
    %c48_91 = arith.constant 48 : index
    %c0_92 = arith.constant 0 : index
    %150 = vector.load %arg18[%c48_91, %c0_92] : memref<144x256xbf16, #tpu.memory_space<vmem>>, vector<16x256xbf16>
    tpu.vector_store %arg18[%c48_91, %c0_92], %149 {strides = array<i32>} : memref<144x256xbf16, #tpu.memory_space<vmem>>, vector<16x256xbf16>,
    %151 = arith.truncf %122 : vector<16x256xf32> to vector<16x256xbf16>
    %c64_93 = arith.constant 64 : index
    %c0_94 = arith.constant 0 : index
    %152 = vector.load %arg18[%c64_93, %c0_94] : memref<144x256xbf16, #tpu.memory_space<vmem>>, vector<16x256xbf16>
    tpu.vector_store %arg18[%c64_93, %c0_94], %151 {strides = array<i32>} : memref<144x256xbf16, #tpu.memory_space<vmem>>, vector<16x256xbf16>,
    %c255_i32_95 = arith.constant 255 : i32
    %153 = tpu.dynamic_rotate %122 by %c255_i32_95 dim 1 : vector<16x256xf32>, i32 -> vector<16x256xf32>
    %c5_96 = arith.constant 5 : index
    %c0_97 = arith.constant 0 : index
    %c0_98 = arith.constant 0 : index
    %154 = vector.load %arg4[%c5_96, %c0_97, %c0_98] : memref<9x1x256xf32, #tpu.memory_space<vmem>>, vector<1x1x256xf32>
    %155 = vector.shape_cast %154 : vector<1x1x256xf32> to vector<1x256xf32>
    %156 = vector.broadcast %155 : vector<1x256xf32> to vector<16x256xf32>
    %157 = arith.mulf %153, %156 : vector<16x256xf32>
    %158 = arith.truncf %157 : vector<16x256xf32> to vector<16x256xbf16>
    %c80 = arith.constant 80 : index
    %c0_99 = arith.constant 0 : index
    %159 = vector.load %arg18[%c80, %c0_99] : memref<144x256xbf16, #tpu.memory_space<vmem>>, vector<16x256xbf16>
    tpu.vector_store %arg18[%c80, %c0_99], %158 {strides = array<i32>} : memref<144x256xbf16, #tpu.memory_space<vmem>>, vector<16x256xbf16>,
    %c241_i32_100 = arith.constant 241 : i32
    %160 = tpu.dynamic_rotate %122 by %c241_i32_100 dim 1 : vector<16x256xf32>, i32 -> vector<16x256xf32>
    %c6_101 = arith.constant 6 : index
    %c0_102 = arith.constant 0 : index
    %c0_103 = arith.constant 0 : index
    %161 = vector.load %arg4[%c6_101, %c0_102, %c0_103] : memref<9x1x256xf32, #tpu.memory_space<vmem>>, vector<1x1x256xf32>
    %162 = vector.shape_cast %161 : vector<1x1x256xf32> to vector<1x256xf32>
    %163 = vector.broadcast %162 : vector<1x256xf32> to vector<16x256xf32>
    %164 = arith.mulf %160, %163 : vector<16x256xf32>
    %165 = arith.truncf %164 : vector<16x256xf32> to vector<16x256xbf16>
    %c96 = arith.constant 96 : index
    %c0_104 = arith.constant 0 : index
    %166 = vector.load %arg18[%c96, %c0_104] : memref<144x256xbf16, #tpu.memory_space<vmem>>, vector<16x256xbf16>
    tpu.vector_store %arg18[%c96, %c0_104], %165 {strides = array<i32>} : memref<144x256xbf16, #tpu.memory_space<vmem>>, vector<16x256xbf16>,
    %c240_i32_105 = arith.constant 240 : i32
    %167 = tpu.dynamic_rotate %122 by %c240_i32_105 dim 1 : vector<16x256xf32>, i32 -> vector<16x256xf32>
    %c7_106 = arith.constant 7 : index
    %c0_107 = arith.constant 0 : index
    %c0_108 = arith.constant 0 : index
    %168 = vector.load %arg4[%c7_106, %c0_107, %c0_108] : memref<9x1x256xf32, #tpu.memory_space<vmem>>, vector<1x1x256xf32>
    %169 = vector.shape_cast %168 : vector<1x1x256xf32> to vector<1x256xf32>
    %170 = vector.broadcast %169 : vector<1x256xf32> to vector<16x256xf32>
    %171 = arith.mulf %167, %170 : vector<16x256xf32>
    %172 = arith.truncf %171 : vector<16x256xf32> to vector<16x256xbf16>
    %c112 = arith.constant 112 : index
    %c0_109 = arith.constant 0 : index
    %173 = vector.load %arg18[%c112, %c0_109] : memref<144x256xbf16, #tpu.memory_space<vmem>>, vector<16x256xbf16>
    tpu.vector_store %arg18[%c112, %c0_109], %172 {strides = array<i32>} : memref<144x256xbf16, #tpu.memory_space<vmem>>, vector<16x256xbf16>,
    %c239_i32_110 = arith.constant 239 : i32
    %174 = tpu.dynamic_rotate %122 by %c239_i32_110 dim 1 : vector<16x256xf32>, i32 -> vector<16x256xf32>
    %c8_111 = arith.constant 8 : index
    %c0_112 = arith.constant 0 : index
    %c0_113 = arith.constant 0 : index
    %175 = vector.load %arg4[%c8_111, %c0_112, %c0_113] : memref<9x1x256xf32, #tpu.memory_space<vmem>>, vector<1x1x256xf32>
    %176 = vector.shape_cast %175 : vector<1x1x256xf32> to vector<1x256xf32>
    %177 = vector.broadcast %176 : vector<1x256xf32> to vector<16x256xf32>
    %178 = arith.mulf %174, %177 : vector<16x256xf32>
    %179 = arith.truncf %178 : vector<16x256xf32> to vector<16x256xbf16>
    %c128 = arith.constant 128 : index
    %c0_114 = arith.constant 0 : index
    %180 = vector.load %arg18[%c128, %c0_114] : memref<144x256xbf16, #tpu.memory_space<vmem>>, vector<16x256xbf16>
    tpu.vector_store %arg18[%c128, %c0_114], %179 {strides = array<i32>} : memref<144x256xbf16, #tpu.memory_space<vmem>>, vector<16x256xbf16>,
    %c0_115 = arith.constant 0 : index
    %c0_116 = arith.constant 0 : index
    %181 = vector.load %arg13[%c0_115, %c0_116] : memref<16x144xbf16, #tpu.memory_space<vmem>>, vector<16x144xbf16>
    %c0_117 = arith.constant 0 : index
    %c0_118 = arith.constant 0 : index
    %182 = vector.load %arg18[%c0_117, %c0_118] : memref<144x256xbf16, #tpu.memory_space<vmem>>, vector<144x256xbf16>
    %cst_119 = arith.constant dense<0.000000e+00> : vector<16x256xf32>
    %183 = tpu.matmul %181, %182, %cst_119 {dimension_numbers = #tpu.dot_dimension_numbers<[1], [0], [0], [1], [0, 0, 1, 1], [], []>} : vector<16x144xbf16>, vector<144x256xbf16>, vector<16x256xf32> -> vector<16x256xf32>
    %cst_120 = arith.constant 0.000000e+00 : f32
    %184 = vector.broadcast %cst_120 : f32 to vector<16x256xf32>
    %185 = arith.subf %184, %183 : vector<16x256xf32>
    %186 = math.exp %185 : vector<16x256xf32>
    %cst_121 = arith.constant 1.000000e+00 : f32
    %187 = vector.broadcast %cst_121 : f32 to vector<16x256xf32>
    %188 = arith.addf %187, %186 : vector<16x256xf32>
    %189 = tpu.reciprocal %188 {approx = true} : vector<16x256xf32> -> vector<16x256xf32>
    %190 = arith.mulf %183, %189 : vector<16x256xf32>
    %c17_i32_122 = arith.constant 17 : i32
    %191 = tpu.dynamic_rotate %190 by %c17_i32_122 dim 1 : vector<16x256xf32>, i32 -> vector<16x256xf32>
    %c0_123 = arith.constant 0 : index
    %c0_124 = arith.constant 0 : index
    %c0_125 = arith.constant 0 : index
    %192 = vector.load %arg4[%c0_123, %c0_124, %c0_125] : memref<9x1x256xf32, #tpu.memory_space<vmem>>, vector<1x1x256xf32>
    %193 = vector.shape_cast %192 : vector<1x1x256xf32> to vector<1x256xf32>
    %194 = vector.broadcast %193 : vector<1x256xf32> to vector<16x256xf32>
    %195 = arith.mulf %191, %194 : vector<16x256xf32>
    %196 = arith.truncf %195 : vector<16x256xf32> to vector<16x256xbf16>
    %c0_126 = arith.constant 0 : index
    %c0_127 = arith.constant 0 : index
    %197 = vector.load %arg18[%c0_126, %c0_127] : memref<144x256xbf16, #tpu.memory_space<vmem>>, vector<16x256xbf16>
    tpu.vector_store %arg18[%c0_126, %c0_127], %196 {strides = array<i32>} : memref<144x256xbf16, #tpu.memory_space<vmem>>, vector<16x256xbf16>,
    %c16_i32_128 = arith.constant 16 : i32
    %198 = tpu.dynamic_rotate %190 by %c16_i32_128 dim 1 : vector<16x256xf32>, i32 -> vector<16x256xf32>
    %c1_129 = arith.constant 1 : index
    %c0_130 = arith.constant 0 : index
    %c0_131 = arith.constant 0 : index
    %199 = vector.load %arg4[%c1_129, %c0_130, %c0_131] : memref<9x1x256xf32, #tpu.memory_space<vmem>>, vector<1x1x256xf32>
    %200 = vector.shape_cast %199 : vector<1x1x256xf32> to vector<1x256xf32>
    %201 = vector.broadcast %200 : vector<1x256xf32> to vector<16x256xf32>
    %202 = arith.mulf %198, %201 : vector<16x256xf32>
    %203 = arith.truncf %202 : vector<16x256xf32> to vector<16x256xbf16>
    %c16_132 = arith.constant 16 : index
    %c0_133 = arith.constant 0 : index
    %204 = vector.load %arg18[%c16_132, %c0_133] : memref<144x256xbf16, #tpu.memory_space<vmem>>, vector<16x256xbf16>
    tpu.vector_store %arg18[%c16_132, %c0_133], %203 {strides = array<i32>} : memref<144x256xbf16, #tpu.memory_space<vmem>>, vector<16x256xbf16>,
    %c15_i32_134 = arith.constant 15 : i32
    %205 = tpu.dynamic_rotate %190 by %c15_i32_134 dim 1 : vector<16x256xf32>, i32 -> vector<16x256xf32>
    %c2_135 = arith.constant 2 : index
    %c0_136 = arith.constant 0 : index
    %c0_137 = arith.constant 0 : index
    %206 = vector.load %arg4[%c2_135, %c0_136, %c0_137] : memref<9x1x256xf32, #tpu.memory_space<vmem>>, vector<1x1x256xf32>
    %207 = vector.shape_cast %206 : vector<1x1x256xf32> to vector<1x256xf32>
    %208 = vector.broadcast %207 : vector<1x256xf32> to vector<16x256xf32>
    %209 = arith.mulf %205, %208 : vector<16x256xf32>
    %210 = arith.truncf %209 : vector<16x256xf32> to vector<16x256xbf16>
    %c32_138 = arith.constant 32 : index
    %c0_139 = arith.constant 0 : index
    %211 = vector.load %arg18[%c32_138, %c0_139] : memref<144x256xbf16, #tpu.memory_space<vmem>>, vector<16x256xbf16>
    tpu.vector_store %arg18[%c32_138, %c0_139], %210 {strides = array<i32>} : memref<144x256xbf16, #tpu.memory_space<vmem>>, vector<16x256xbf16>,
    %c1_i32_140 = arith.constant 1 : i32
    %212 = tpu.dynamic_rotate %190 by %c1_i32_140 dim 1 : vector<16x256xf32>, i32 -> vector<16x256xf32>
    %c3_141 = arith.constant 3 : index
    %c0_142 = arith.constant 0 : index
    %c0_143 = arith.constant 0 : index
    %213 = vector.load %arg4[%c3_141, %c0_142, %c0_143] : memref<9x1x256xf32, #tpu.memory_space<vmem>>, vector<1x1x256xf32>
    %214 = vector.shape_cast %213 : vector<1x1x256xf32> to vector<1x256xf32>
    %215 = vector.broadcast %214 : vector<1x256xf32> to vector<16x256xf32>
    %216 = arith.mulf %212, %215 : vector<16x256xf32>
    %217 = arith.truncf %216 : vector<16x256xf32> to vector<16x256xbf16>
    %c48_144 = arith.constant 48 : index
    %c0_145 = arith.constant 0 : index
    %218 = vector.load %arg18[%c48_144, %c0_145] : memref<144x256xbf16, #tpu.memory_space<vmem>>, vector<16x256xbf16>
    tpu.vector_store %arg18[%c48_144, %c0_145], %217 {strides = array<i32>} : memref<144x256xbf16, #tpu.memory_space<vmem>>, vector<16x256xbf16>,
    %219 = arith.truncf %190 : vector<16x256xf32> to vector<16x256xbf16>
    %c64_146 = arith.constant 64 : index
    %c0_147 = arith.constant 0 : index
    %220 = vector.load %arg18[%c64_146, %c0_147] : memref<144x256xbf16, #tpu.memory_space<vmem>>, vector<16x256xbf16>
    tpu.vector_store %arg18[%c64_146, %c0_147], %219 {strides = array<i32>} : memref<144x256xbf16, #tpu.memory_space<vmem>>, vector<16x256xbf16>,
    %c255_i32_148 = arith.constant 255 : i32
    %221 = tpu.dynamic_rotate %190 by %c255_i32_148 dim 1 : vector<16x256xf32>, i32 -> vector<16x256xf32>
    %c5_149 = arith.constant 5 : index
    %c0_150 = arith.constant 0 : index
    %c0_151 = arith.constant 0 : index
    %222 = vector.load %arg4[%c5_149, %c0_150, %c0_151] : memref<9x1x256xf32, #tpu.memory_space<vmem>>, vector<1x1x256xf32>
    %223 = vector.shape_cast %222 : vector<1x1x256xf32> to vector<1x256xf32>
    %224 = vector.broadcast %223 : vector<1x256xf32> to vector<16x256xf32>
    %225 = arith.mulf %221, %224 : vector<16x256xf32>
    %226 = arith.truncf %225 : vector<16x256xf32> to vector<16x256xbf16>
    %c80_152 = arith.constant 80 : index
    %c0_153 = arith.constant 0 : index
    %227 = vector.load %arg18[%c80_152, %c0_153] : memref<144x256xbf16, #tpu.memory_space<vmem>>, vector<16x256xbf16>
    tpu.vector_store %arg18[%c80_152, %c0_153], %226 {strides = array<i32>} : memref<144x256xbf16, #tpu.memory_space<vmem>>, vector<16x256xbf16>,
    %c241_i32_154 = arith.constant 241 : i32
    %228 = tpu.dynamic_rotate %190 by %c241_i32_154 dim 1 : vector<16x256xf32>, i32 -> vector<16x256xf32>
    %c6_155 = arith.constant 6 : index
    %c0_156 = arith.constant 0 : index
    %c0_157 = arith.constant 0 : index
    %229 = vector.load %arg4[%c6_155, %c0_156, %c0_157] : memref<9x1x256xf32, #tpu.memory_space<vmem>>, vector<1x1x256xf32>
    %230 = vector.shape_cast %229 : vector<1x1x256xf32> to vector<1x256xf32>
    %231 = vector.broadcast %230 : vector<1x256xf32> to vector<16x256xf32>
    %232 = arith.mulf %228, %231 : vector<16x256xf32>
    %233 = arith.truncf %232 : vector<16x256xf32> to vector<16x256xbf16>
    %c96_158 = arith.constant 96 : index
    %c0_159 = arith.constant 0 : index
    %234 = vector.load %arg18[%c96_158, %c0_159] : memref<144x256xbf16, #tpu.memory_space<vmem>>, vector<16x256xbf16>
    tpu.vector_store %arg18[%c96_158, %c0_159], %233 {strides = array<i32>} : memref<144x256xbf16, #tpu.memory_space<vmem>>, vector<16x256xbf16>,
    %c240_i32_160 = arith.constant 240 : i32
    %235 = tpu.dynamic_rotate %190 by %c240_i32_160 dim 1 : vector<16x256xf32>, i32 -> vector<16x256xf32>
    %c7_161 = arith.constant 7 : index
    %c0_162 = arith.constant 0 : index
    %c0_163 = arith.constant 0 : index
    %236 = vector.load %arg4[%c7_161, %c0_162, %c0_163] : memref<9x1x256xf32, #tpu.memory_space<vmem>>, vector<1x1x256xf32>
    %237 = vector.shape_cast %236 : vector<1x1x256xf32> to vector<1x256xf32>
    %238 = vector.broadcast %237 : vector<1x256xf32> to vector<16x256xf32>
    %239 = arith.mulf %235, %238 : vector<16x256xf32>
    %240 = arith.truncf %239 : vector<16x256xf32> to vector<16x256xbf16>
    %c112_164 = arith.constant 112 : index
    %c0_165 = arith.constant 0 : index
    %241 = vector.load %arg18[%c112_164, %c0_165] : memref<144x256xbf16, #tpu.memory_space<vmem>>, vector<16x256xbf16>
    tpu.vector_store %arg18[%c112_164, %c0_165], %240 {strides = array<i32>} : memref<144x256xbf16, #tpu.memory_space<vmem>>, vector<16x256xbf16>,
    %c239_i32_166 = arith.constant 239 : i32
    %242 = tpu.dynamic_rotate %190 by %c239_i32_166 dim 1 : vector<16x256xf32>, i32 -> vector<16x256xf32>
    %c8_167 = arith.constant 8 : index
    %c0_168 = arith.constant 0 : index
    %c0_169 = arith.constant 0 : index
    %243 = vector.load %arg4[%c8_167, %c0_168, %c0_169] : memref<9x1x256xf32, #tpu.memory_space<vmem>>, vector<1x1x256xf32>
    %244 = vector.shape_cast %243 : vector<1x1x256xf32> to vector<1x256xf32>
    %245 = vector.broadcast %244 : vector<1x256xf32> to vector<16x256xf32>
    %246 = arith.mulf %242, %245 : vector<16x256xf32>
    %247 = arith.truncf %246 : vector<16x256xf32> to vector<16x256xbf16>
    %c128_170 = arith.constant 128 : index
    %c0_171 = arith.constant 0 : index
    %248 = vector.load %arg18[%c128_170, %c0_171] : memref<144x256xbf16, #tpu.memory_space<vmem>>, vector<16x256xbf16>
    tpu.vector_store %arg18[%c128_170, %c0_171], %247 {strides = array<i32>} : memref<144x256xbf16, #tpu.memory_space<vmem>>, vector<16x256xbf16>,
    %c0_172 = arith.constant 0 : index
    %c0_173 = arith.constant 0 : index
    %249 = vector.load %arg14[%c0_172, %c0_173] : memref<8x144xbf16, #tpu.memory_space<vmem>>, vector<8x144xbf16>
    %c0_174 = arith.constant 0 : index
    %c0_175 = arith.constant 0 : index
    %250 = vector.load %arg18[%c0_174, %c0_175] : memref<144x256xbf16, #tpu.memory_space<vmem>>, vector<144x256xbf16>
    %cst_176 = arith.constant dense<0.000000e+00> : vector<8x256xf32>
    %251 = tpu.matmul %249, %250, %cst_176 {dimension_numbers = #tpu.dot_dimension_numbers<[1], [0], [0], [1], [0, 0, 1, 1], [], []>} : vector<8x144xbf16>, vector<144x256xbf16>, vector<8x256xf32> -> vector<8x256xf32>
    %cst_177 = arith.constant dense<0.000000e+00> : vector<8xf32>
    %252 = vector.multi_reduction <add>, %251, %cst_177 [1] : vector<8x256xf32> to vector<8xf32>
    %253 = vector.shape_cast %252 : vector<8xf32> to vector<8x1xf32>
    %cst_178 = arith.constant dense<0.000000e+00> : vector<8x1xf32>
    %254 = tpu.matmul %0, %253, %cst_178 {dimension_numbers = #tpu.dot_dimension_numbers<[1], [0], [0], [1], [0, 0, 1, 1], [], []>} : vector<8x8xf32>, vector<8x1xf32>, vector<8x1xf32> -> vector<8x1xf32>
    %cst_179 = arith.constant 3.906250e-03 : f32
    %255 = vector.broadcast %cst_179 : f32 to vector<8x1xf32>
    %256 = arith.mulf %254, %255 : vector<8x1xf32>
    %257 = vector.broadcast %256 : vector<8x1xf32> to vector<8x256xf32>
    %258 = arith.subf %251, %257 : vector<8x256xf32>
    %259 = arith.mulf %258, %258 : vector<8x256xf32>
    %cst_180 = arith.constant dense<0.000000e+00> : vector<8xf32>
    %260 = vector.multi_reduction <add>, %259, %cst_180 [1] : vector<8x256xf32> to vector<8xf32>
    %261 = vector.shape_cast %260 : vector<8xf32> to vector<8x1xf32>
    %cst_181 = arith.constant dense<0.000000e+00> : vector<8x1xf32>
    %262 = tpu.matmul %0, %261, %cst_181 {dimension_numbers = #tpu.dot_dimension_numbers<[1], [0], [0], [1], [0, 0, 1, 1], [], []>} : vector<8x8xf32>, vector<8x1xf32>, vector<8x1xf32> -> vector<8x1xf32>
    %cst_182 = arith.constant 3.906250e-03 : f32
    %263 = vector.broadcast %cst_182 : f32 to vector<8x1xf32>
    %264 = arith.mulf %262, %263 : vector<8x1xf32>
    %cst_183 = arith.constant 9.99999974E-6 : f32
    %265 = vector.broadcast %cst_183 : f32 to vector<8x1xf32>
    %266 = arith.addf %264, %265 : vector<8x1xf32>
    %267 = math.rsqrt %266 : vector<8x1xf32>
    %268 = vector.broadcast %267 : vector<8x1xf32> to vector<8x256xf32>
    %269 = arith.mulf %258, %268 : vector<8x256xf32>
    %c0_184 = arith.constant 0 : index
    %c0_185 = arith.constant 0 : index
    %270 = vector.load %arg15[%c0_184, %c0_185] : memref<8x1xf32, #tpu.memory_space<vmem>>, vector<8x1xf32>
    %271 = vector.broadcast %270 : vector<8x1xf32> to vector<8x256xf32>
    %272 = arith.mulf %269, %271 : vector<8x256xf32>
    %c0_186 = arith.constant 0 : index
    %c0_187 = arith.constant 0 : index
    %273 = vector.load %arg16[%c0_186, %c0_187] : memref<8x1xf32, #tpu.memory_space<vmem>>, vector<8x1xf32>
    %274 = vector.broadcast %273 : vector<8x1xf32> to vector<8x256xf32>
    %275 = arith.addf %272, %274 : vector<8x256xf32>
    %cst_188 = arith.constant 0.000000e+00 : f32
    %276 = vector.broadcast %cst_188 : f32 to vector<8x256xf32>
    %277 = arith.subf %276, %275 : vector<8x256xf32>
    %278 = math.exp %277 : vector<8x256xf32>
    %cst_189 = arith.constant 1.000000e+00 : f32
    %279 = vector.broadcast %cst_189 : f32 to vector<8x256xf32>
    %280 = arith.addf %279, %278 : vector<8x256xf32>
    %281 = tpu.reciprocal %280 {approx = true} : vector<8x256xf32> -> vector<8x256xf32>
    %282 = arith.mulf %275, %281 : vector<8x256xf32>
    %c0_190 = arith.constant 0 : index
    %c0_191 = arith.constant 0 : index
    %c0_192 = arith.constant 0 : index
    %283 = vector.load %arg17[%c0_190, %c0_191, %c0_192] : memref<1x8x256xf32, #tpu.memory_space<vmem>>, vector<1x8x256xf32>
    %284 = vector.shape_cast %283 : vector<1x8x256xf32> to vector<8x256xf32>
    %285 = vector.shape_cast %282 : vector<8x256xf32> to vector<1x8x256xf32>
    tpu.vector_store %arg17[%c0_190, %c0_191, %c0_192], %285 {strides = array<i32>} : memref<1x8x256xf32, #tpu.memory_space<vmem>>, vector<1x8x256xf32>,
    return
  }
  func.func @transform_0(%arg0: i32) -> (i32, i32, i32) {
    %c0_i32 = arith.constant 0 : i32
    %c0_i32_0 = arith.constant 0 : i32
    %c0_i32_1 = arith.constant 0 : i32
    return %arg0, %c0_i32, %c0_i32_0 : i32, i32, i32
  }
  func.func @transform_1(%arg0: i32) -> (i32, i32, i32) {
    %c0_i32 = arith.constant 0 : i32
    %c0_i32_0 = arith.constant 0 : i32
    %c0_i32_1 = arith.constant 0 : i32
    return %arg0, %c0_i32, %c0_i32_0 : i32, i32, i32
  }
  func.func @transform_2(%arg0: i32) -> (i32, i32) {
    %c0_i32 = arith.constant 0 : i32
    %c0_i32_0 = arith.constant 0 : i32
    %c0_i32_1 = arith.constant 0 : i32
    return %c0_i32, %c0_i32_0 : i32, i32
  }
  func.func @transform_3(%arg0: i32) -> (i32, i32, i32) {
    %c0_i32 = arith.constant 0 : i32
    %c0_i32_0 = arith.constant 0 : i32
    %c0_i32_1 = arith.constant 0 : i32
    %c0_i32_2 = arith.constant 0 : i32
    return %c0_i32, %c0_i32_0, %c0_i32_1 : i32, i32, i32
  }
  func.func @transform_4(%arg0: i32) -> (i32, i32) {
    %c0_i32 = arith.constant 0 : i32
    %c0_i32_0 = arith.constant 0 : i32
    %c0_i32_1 = arith.constant 0 : i32
    return %c0_i32, %c0_i32_0 : i32, i32
  }
  func.func @transform_5(%arg0: i32) -> (i32, i32) {
    %c0_i32 = arith.constant 0 : i32
    %c0_i32_0 = arith.constant 0 : i32
    %c0_i32_1 = arith.constant 0 : i32
    return %c0_i32, %c0_i32_0 : i32, i32
  }
  func.func @transform_6(%arg0: i32) -> (i32, i32) {
    %c0_i32 = arith.constant 0 : i32
    %c0_i32_0 = arith.constant 0 : i32
    %c0_i32_1 = arith.constant 0 : i32
    return %c0_i32, %c0_i32_0 : i32, i32
  }
  func.func @transform_7(%arg0: i32) -> (i32, i32) {
    %c0_i32 = arith.constant 0 : i32
    %c0_i32_0 = arith.constant 0 : i32
    %c0_i32_1 = arith.constant 0 : i32
    return %c0_i32, %c0_i32_0 : i32, i32
  }
  func.func @transform_8(%arg0: i32) -> (i32, i32) {
    %c0_i32 = arith.constant 0 : i32
    %c0_i32_0 = arith.constant 0 : i32
    %c0_i32_1 = arith.constant 0 : i32
    return %c0_i32, %c0_i32_0 : i32, i32
  }
  func.func @transform_9(%arg0: i32) -> (i32, i32) {
    %c0_i32 = arith.constant 0 : i32
    %c0_i32_0 = arith.constant 0 : i32
    %c0_i32_1 = arith.constant 0 : i32
    return %c0_i32, %c0_i32_0 : i32, i32
  }
  func.func @transform_10(%arg0: i32) -> (i32, i32) {
    %c0_i32 = arith.constant 0 : i32
    %c0_i32_0 = arith.constant 0 : i32
    %c0_i32_1 = arith.constant 0 : i32
    return %c0_i32, %c0_i32_0 : i32, i32
  }
  func.func @transform_11(%arg0: i32) -> (i32, i32) {
    %c0_i32 = arith.constant 0 : i32
    %c0_i32_0 = arith.constant 0 : i32
    %c0_i32_1 = arith.constant 0 : i32
    return %c0_i32, %c0_i32_0 : i32, i32
  }
  func.func @transform_12(%arg0: i32) -> (i32, i32) {
    %c0_i32 = arith.constant 0 : i32
    %c0_i32_0 = arith.constant 0 : i32
    %c0_i32_1 = arith.constant 0 : i32
    return %c0_i32, %c0_i32_0 : i32, i32
  }
  func.func @transform_13(%arg0: i32) -> (i32, i32) {
    %c0_i32 = arith.constant 0 : i32
    %c0_i32_0 = arith.constant 0 : i32
    %c0_i32_1 = arith.constant 0 : i32
    return %c0_i32, %c0_i32_0 : i32, i32
  }
  func.func @transform_14(%arg0: i32) -> (i32, i32) {
    %c0_i32 = arith.constant 0 : i32
    %c0_i32_0 = arith.constant 0 : i32
    %c0_i32_1 = arith.constant 0 : i32
    return %c0_i32, %c0_i32_0 : i32, i32
  }
  func.func @transform_15(%arg0: i32) -> (i32, i32) {
    %c0_i32 = arith.constant 0 : i32
    %c0_i32_0 = arith.constant 0 : i32
    %c0_i32_1 = arith.constant 0 : i32
    return %c0_i32, %c0_i32_0 : i32, i32
  }
  func.func @transform_16(%arg0: i32) -> (i32, i32, i32) {
    %c0_i32 = arith.constant 0 : i32
    %c0_i32_0 = arith.constant 0 : i32
    %c0_i32_1 = arith.constant 0 : i32
    return %arg0, %c0_i32, %c0_i32_0 : i32, i32, i32
  }
}

</mosaic_0001>

<bundles_post_ra>
// kernel: expansion_block2_forward.1
= control target key start
LH: loop header
LB: loop body
LE: loop exit
PB: predicated region body
PF: predicated region fallthrough
CT: control target
= control target key end

     0   :  { %s2599_s21 = smov 0   ;;  %s3235_s0 = inlined_call_operand.vmem [shape: bf16[2,16,64], index: 0, kind: input, shape index: {}]   ;;  %s3236_s1 = inlined_call_operand.vmem [shape: f32[2,8,256], index: 1, kind: input, shape index: {}]   ;;  %s3237_s2 = inlined_call_operand.vmem [shape: bf16[64,256], index: 2, kind: input, shape index: {}]   ;;  %s3238_s3 = inlined_call_operand.vmem [shape: f32[9,1,256], index: 3, kind: input, shape index: {}]   ;;  %s3239_s4 = inlined_call_operand.vmem [shape: f32[8,8], index: 4, kind: input, shape index: {}]   ;;  %s3240_s5 = inlined_call_operand.vmem [shape: bf16[8,16], index: 5, kind: input, shape index: {}]   ;;  %s3241_s6 = inlined_call_operand.vmem [shape: f32[8,1], index: 6, kind: input, shape index: {}]   ;;  %s3242_s7 = inlined_call_operand.vmem [shape: f32[8,1], index: 7, kind: input, shape index: {}]   ;;  %s3243_s8 = inlined_call_operand.vmem [shape: bf16[8,72], index: 8, kind: input, shape index: {}]   ;;  %s3244_s9 = inlined_call_operand.vmem [shape: f32[8,1], index: 9, kind: input, shape index: {}]   ;;  %s3245_s10 = inlined_call_operand.vmem [shape: f32[8,1], index: 10, kind: input, shape index: {}]   ;;  %s3246_s11 = inlined_call_operand.vmem [shape: f32[8,1], index: 11, kind: input, shape index: {}]   ;;  %s3247_s12 = inlined_call_operand.vmem [shape: bf16[16,144], index: 12, kind: input, shape index: {}]   ;;  %s3248_s13 = inlined_call_operand.vmem [shape: bf16[8,144], index: 13, kind: input, shape index: {}]   ;;  %s3249_s14 = inlined_call_operand.vmem [shape: f32[8,1], index: 14, kind: input, shape index: {}]   ;;  %s3250_s15 = inlined_call_operand.vmem [shape: f32[8,1], index: 15, kind: input, shape index: {}]   ;;  %s3251_s16 = inlined_call_operand.vmem [shape: f32[2,8,256], index: 16, kind: output, shape index: {}]  }
   0x1   :  { %3263 = sst [smem:[#allocation3_spill]] %s3235_s0 }
   0x2 LB: > { %s2313_s22 = sadd.s32 4294967295, %s2501_s21   ;;  %p2317_p0 = scmp.ge.s32.totalorder %s2501_s21, 1  ;;  %s2501_s21 = sphi %s2599_s21, %s26_s21  }
   0x3   : > { %p472_p1 = scmp.lt.s32.totalorder %s2501_s21, 3 }
   0x5   : > { %p473_p2 = pnand %p2317_p0, %p472_p1 }
   0x6   : > { %p527_p3 = scmp.lt.s32.totalorder (!%p473_p2), %s2313_s22, 1  ;;  %v2503_v0 = vmov (!%p473_p2), 0.0   ;;  %vm2504_vm0 = vmmov (!%p473_p2), 0   ;;  %s3264_s27 = sld [smem:[#allocation3_spill]] (!%p473_p2)  ;;  %v548_v6 = vld [vmem:[%s3240_s5] sm:$0xf] (!%p473_p2)  ;;  %v878_v21 = vlaneseq (!%p473_p2) }
   0x7   : > { %476 = sbr.rel (%p473_p2) target bundleno = 3954 (0xf72), region = 84  ;;  %2389 = vmatprep.subr.bf16.mxu0 (!%p473_p2), %v2503_v0  ;;  %2391 = vmatprep.mubr.msk.bf16.mxu0 (!%p473_p2), %vm2504_vm0, %v2503_v0  ;;  %vm555_vm1 = vcmask (!%p473_p2), 130048   ;;  %vm599_vm2 = vcmask (!%p473_p2), 523264   ;;  %v2640_v12 = vld [vmem:[%s3239_s4] sm:$0xff] (!%p473_p2)  ;;  %vm603_vm3 = vcmask (!%p473_p2), 64512   ;;  %v2505_v14 = vmov (!%p473_p2), 0  }
   0x8   : > { %2395 = vmatprep.subr.mxu1 (!%p473_p2), %v2503_v0  ;;  %2397 = vmatprep.mubr.msk.f32.mxu1 (!%p473_p2), %vm2504_vm0, %v2503_v0  ;;  %s2507_s25 = smov (!%p473_p2), 17   ;;  %s3261_s26 = smov (!%p473_p2), 1   ;;  %v1122_v18 = vld [vmem:[%s3244_s9] sm:$0xff] (!%p473_p2)  ;;  %v2678_v22 = vand.u32 (!%p473_p2), 127, %v878_v21  ;;  %v886_v23 = vshrl.u32 (!%p473_p2), %v878_v21, 7  ;;  %vm1132_vm12 = vcmask (!%p473_p2), 1043456  }
   0x9   : > { %2444 = vset.pattern.permute.xlu0 (!%p473_p2), %v2505_v14  ;;  %2445 = vset.pattern.permute.xlu1 (!%p473_p2), %v2505_v14  ;;  %s3253_s29 = smov (!%p473_p2), 112   ;;  %s3257_s30 = smov (!%p473_p2), 113   ;;  %v767_v19 = vld [vmem:[%s3241_s6] sm:$0xff] (!%p473_p2)  ;;  %v2342_v21 = vld [vmem:[%s3238_s3 + $0xe] sm:$0x3] (!%p473_p2)  ;;  %vm1128_vm13 = vcmask (!%p473_p2), 588800  }
   0xa   : > { %v2337_v24 = vld [vmem:[%s3238_s3 + $0x2] sm:$0x3] (!%p473_p2)  ;;  %v2683_v25 = vsub.s32 (!%p473_p2), 0, %v886_v23  ;;  %v2685_v26 = vsub.s32 (!%p473_p2), 1, %v886_v23  ;;  %vm905_vm4 = vcmp.lt.s32.totalorder (!%p473_p2), %v2678_v22, 16  ;;  %vm880_vm5 = vcmp.lt.s32.totalorder (!%p473_p2), %v2678_v22, 17 }
   0xb   : > { %v883_v32 = vld [vmem:[%s3238_s3] sm:$0x3] (!%p473_p2)  ;;  %v2339_v47 = vld [vmem:[%s3238_s3 + $0x6] sm:$0x3] (!%p473_p2)  ;;  %vm963_vm6 = vcmp.lt.s32.totalorder (!%p473_p2), %v2678_v22, 1  ;;  %vm937_vm7 = vcmp.lt.s32.totalorder (!%p473_p2), %v2678_v22, 15 }
   0xc   : > { %v914_v30 = vrot.slane (!%p473_p2), %v2337_v24, %v2683_v25  ;;  %v918_v31 = vrot.slane (!%p473_p2), %v2337_v24, %v2685_v26  ;;  %v888_v38 = vrot.slane (!%p473_p2), %v883_v32, %v2683_v25  ;;  %v892_v39 = vrot.slane (!%p473_p2), %v883_v32, %v2685_v26  ;;  %v2338_v58 = vld [vmem:[%s3238_s3 + $0x4] sm:$0x3] (!%p473_p2)  ;;  %s3267_s19 = smov (!%p473_p2), 113   ;;  %s3268_s20 = smov (!%p473_p2), 112  }
   0xd   : > { %v972_v51 = vrot.slane (!%p473_p2), %v2339_v47, %v2683_v25  ;;  %v976_v52 = vrot.slane (!%p473_p2), %v2339_v47, %v2685_v26  ;;  %vm999_vm8 = vcmp.lt.s32.totalorder (!%p473_p2), %v2678_v22, 127  ;;  %vm1057_vm9 = vcmp.lt.s32.totalorder (!%p473_p2), %v2678_v22, 112  ;;  %s3269_s17 = smov (!%p473_p2), 111  }
   0xe   : > { %s3272_s22 = smov (!%p527_p3, %s2313_s22), 1  ;;  %v1070_v32 = vrot.slane %v2342_v21, %v2685_v26  ;;  %vm1031_vm10 = vcmp.lt.s32.totalorder %v2678_v22, 113  ;;  %vm1089_vm11 = vcmp.lt.s32.totalorder %v2678_v22, 111 }
   0xf   : > { %s2372_s23 = sshll.u32 %s3272_s22, 3  ;;  %s3252_s24 = sshll.u32 %s3272_s22, 4 }
  0x10   : > { %s531_s28 = scalar_lea.vmem %s3264_s27, %s2372_s23  ;;  %s536_s0 = scalar_lea.vmem %s3236_s1, %s3252_s24 }
  0x11   : > { %v546_v1 = vld [vmem:[%s536_s0] sm:$0xff]  ;;  %v2625_v2 = vld [vmem:[%s536_s0 + $0x8] sm:$0xff]  ;;  %s2506_s23 = smov 16   ;;  %s2509_s27 = smov 15  }
  0x12   : > { %v2446_v3 = vld [vmem:[%s531_s28] sm:$0xff]   ;;  %v991_v4 = vpack.c.bf16 %v546_v1, %v546_v1  ;;  %v992_v5 = vpack.c.bf16 %v2625_v2, %v2625_v2  ;;  %901 = vrot.lane.b32.xlu1 %v546_v1, %s2506_s23  ;;  %s3259_s28 = smov 127   ;;  %s3255_s0 = smov 111  }
  0x13   : > { %2390 = vmatpush3.bf16.msra.mxu0 %v2446_v3  ;;  %v950_v3 = vrot.slane %v2338_v58, %v2685_v26 }
  0x14   : > { %993 = vst [vmem:[#allocation2 + $0x20] sm:$0xf] %v991_v4  ;;  %994 = vst [vmem:[#allocation2 + $0x28] sm:$0xf] %v992_v5 }
  0x16   : > { %2392 = vmatmul.mubr.msk.bf16.vlgmr.msra.gmra.mrb[0].mxu0 %vm555_vm1, %v548_v6  ;;  %903 = vrot.lane.b32.xlu1 %v2625_v2, %s2506_s23 }
  0x17   : > { %865 = vmatprep.mubr.bf16.mxu0 %v2505_v14 }
  0x1a   : > { %874 = vrot.lane.b32.xlu1 %v546_v1, %s2507_s25 }
  0x1e   : > { %876 = vrot.lane.b32.xlu1 %v2625_v2, %s2507_s25 }
  0x22   : > { %959 = vrot.lane.b32.xlu1 %v546_v1, %s3261_s26 }
  0x26   : > { %961 = vrot.lane.b32.xlu1 %v2625_v2, %s3261_s26  ;;  %s3265_s26 = smov 1  }
  0x2a   : > { %933 = vrot.lane.b32.xlu1 %v546_v1, %s2509_s27 }
  0x2e   : > { %935 = vrot.lane.b32.xlu1 %v2625_v2, %s2509_s27 }
  0x32   : > { %997 = vrot.lane.b32.xlu1 %v2625_v2, %s3259_s28 }
  0x36   : > { %1055 = vrot.lane.b32.xlu1 %v2625_v2, %s3253_s29 }
  0x3a   : > { %1029 = vrot.lane.b32.xlu1 %v2625_v2, %s3257_s30 }
  0x84   : > { %v902_v20 = vpop.permute.xlu1 %901 }
  0x88   : > { %v904_v27 = vpop.permute.xlu1 %903 }
  0x89   : > { %v906_v28 = vsel %vm905_vm4, %v902_v20, %v904_v27  ;;  %v907_v29 = vsel %vm905_vm4, %v904_v27, %v902_v20 }
  0x8a   : > { %v921_v33 = vmul.f32 %v914_v30, %v907_v29  ;;  %v922_v34 = vmul.f32 %v918_v31, %v906_v28  ;;  %v1066_v31 = vrot.slane %v2342_v21, %v2683_v25  ;;  %v2447_v21 = vld [vmem:[%s3237_s2] ss:$8 sps:$4 sm:$0xff]  }
  0x8c   : > { %v875_v35 = vpop.permute.xlu1 %874  ;;  %v923_v36 = vpack.c.bf16 %v921_v33, %v921_v33  ;;  %v924_v37 = vpack.c.bf16 %v922_v34, %v922_v34  ;;  %v2341_v33 = vld [vmem:[%s3238_s3 + $0xc] sm:$0x3] }
  0x8e   : > { %v927_v40 = vrot.slane %v923_v36, 4  ;;  %v928_v41 = vrot.slane %v924_v37, 4 }
  0x90   : > { %v877_v42 = vpop.permute.xlu1 %876  ;;  %931 = vst [vmem:[#allocation2] sm:$0xf0] %v927_v40  ;;  %932 = vst [vmem:[#allocation2 + $0x8] sm:$0xf0] %v928_v41  ;;  %v1044_v40 = vrot.slane %v2341_v33, %v2685_v26 }
  0x91   : > { %v881_v43 = vsel %vm880_vm5, %v875_v35, %v877_v42  ;;  %v882_v44 = vsel %vm880_vm5, %v877_v42, %v875_v35 }
  0x92   : > { %v895_v45 = vmul.f32 %v888_v38, %v882_v44  ;;  %v896_v46 = vmul.f32 %v892_v39, %v881_v43  ;;  %v1040_v39 = vrot.slane %v2341_v33, %v2683_v25  ;;  %v2453_v33 = vld [vmem:[%s3237_s2 + $0x20] ss:$8 sps:$4 sm:$0xff]  }
  0x94   : > { %v897_v48 = vpack.c.bf16 %v895_v45, %v895_v45  ;;  %v898_v49 = vpack.c.bf16 %v896_v46, %v896_v46  ;;  %v960_v50 = vpop.permute.xlu1 %959 }
  0x96   : > { %899 = vst [vmem:[#allocation2] sm:$0xf] %v897_v48  ;;  %900 = vst [vmem:[#allocation2 + $0x8] sm:$0xf] %v898_v49 }
  0x98   : > { %v962_v53 = vpop.permute.xlu1 %961 }
  0x99   : > { %v964_v54 = vsel %vm963_vm6, %v960_v50, %v962_v53  ;;  %v965_v55 = vsel %vm963_vm6, %v962_v53, %v960_v50 }
  0x9a   : > { %v979_v56 = vmul.f32 %v972_v51, %v965_v55  ;;  %v980_v57 = vmul.f32 %v976_v52, %v964_v54 }
  0x9c   : > { %v981_v59 = vpack.c.bf16 %v979_v56, %v979_v56  ;;  %v982_v60 = vpack.c.bf16 %v980_v57, %v980_v57  ;;  %v934_v61 = vpop.permute.xlu1 %933  ;;  %v2343_v57 = vld [vmem:[%s3238_s3 + $0x10] sm:$0x3] }
  0x9e   : > { %v985_v62 = vrot.slane %v981_v59, 4  ;;  %v986_v63 = vrot.slane %v982_v60, 4  ;;  %v1113_v59 = vld [vmem:[#allocation2 + $0x8] sm:$0xff]  ;;  %v1112_v60 = vld [vmem:[#allocation2] sm:$0xff] }
  0xa0   : > { %989 = vst [vmem:[#allocation2 + $0x10] sm:$0xf0] %v985_v62  ;;  %990 = vst [vmem:[#allocation2 + $0x18] sm:$0xf0] %v986_v63  ;;  %v936_v4 = vpop.permute.xlu1 %935  ;;  %v1102_v62 = vrot.slane %v2343_v57, %v2685_v26 }
  0xa1   : > { %v938_v5 = vsel %vm937_vm7, %v934_v61, %v936_v4  ;;  %v939_v6 = vsel %vm937_vm7, %v936_v4, %v934_v61  ;;  %v1098_v61 = vrot.slane %v2343_v57, %v2683_v25 }
  0xe9   : > { %v2633_v7 = vpop.f32.mrb[0].mxu0 }
  0xea   : > { %v2393_v8 = vpop.f32.mrb[1].mxu0  ;;  %v600_v9 = vsel %vm599_vm2, %v2633_v7, 0.0 }
  0xeb   : > { %601 = vadd.xlane.f32.xlu0 %v600_v9  ;;  %v596_v10 = vpop.f32.mrb[2].mxu0  ;;  %v954_v9 = vmul.f32 %v950_v3, %v938_v5 }
  0xec   : > { %v2394_v11 = vpop.f32.mrb[3].mxu0 }
  0xed   : > { %v956_v11 = vpack.c.bf16 %v954_v9, %v954_v9 }
  0xef   : > { %958 = vst [vmem:[#allocation2 + $0x18] sm:$0xf] %v956_v11 }
 0x178   : > { %v602_v13 = vpop.xlane.xlu0 %601 }
 0x179   : > { %2396 = vmatpush3.msra.mxu1 %v602_v13  ;;  %v998_v13 = vpop.permute.xlu1 %997 }
 0x17a   : > { %2398 = vmatmul.mubr.msk.f32.vlgmr.msra.gmra.mrb[0].mxu1 %vm603_vm3, %v2640_v12  ;;  %2400 = vmatprep.subr.mxu1 %v2503_v0 }
 0x17b   : > { %2402 = vmatprep.mubr.msk.f32.mxu1 %vm2504_vm0, %v2503_v0 }
 0x17d   : > { %v1056_v24 = vpop.permute.xlu1 %1055 }
 0x181   : > { %v1030_v45 = vpop.permute.xlu1 %1029 }
 0x24d   : > { %v673_v15 = vpop.f32.mrb[0].mxu1 }
 0x24e   : > { %v677_v16 = vmul.f32 0.015625, %v673_v15  ;;  %v2399_v17 = vpop.f32.mrb[1].mxu1  ;;  %v2340_v15 = vld [vmem:[%s3238_s3 + $0xa] sm:$0x3] }
 0x250   : > { %680 = vperm.xlu0 %2444, %v677_v16  }
 0x254   : > { %995 = vrot.lane.b32.xlu0 %v546_v1, %s3259_s28  ;;  %s3266_s28 = smov 127  }
 0x258   : > { %1053 = vrot.lane.b32.xlu0 %v546_v1, %s3253_s29 }
 0x25c   : > { %1027 = vrot.lane.b32.xlu0 %v546_v1, %s3257_s30  ;;  %s3270_s30 = sshll.u32 %s3272_s22, 4 }
 0x260   : > { %1085 = vrot.lane.b32.xlu0 %v546_v1, %s3255_s0  ;;  %v946_v1 = vrot.slane %v2338_v58, %v2683_v25 }
 0x262   : > { %v953_v8 = vmul.f32 %v946_v1, %v939_v6 }
 0x264   : > { %1125 = vperm.xlu0 %2444, %v1122_v18   ;;  %v955_v10 = vpack.c.bf16 %v953_v8, %v953_v8  ;;  %v1008_v18 = vrot.slane %v2340_v15, %v2683_v25 }
 0x266   : > { %957 = vst [vmem:[#allocation2 + $0x10] sm:$0xf] %v955_v10 }
 0x268   : > { %770 = vperm.xlu0 %2444, %v767_v19   ;;  %v1012_v19 = vrot.slane %v2340_v15, %v2685_v26 }
 0x26d   : > { %v1114_v8 = vld [vmem:[#allocation2 + $0x10] sm:$0xff] }
 0x2cf   : > { %v681_v16 = vpop.permute.xlu0 %680 }
 0x2d0   : > { %v2728_v17 = vsub.f32 %v2633_v7, %v681_v16 }
 0x2d2   : > { %v684_v20 = vmul.f32 %v2728_v17, %v2728_v17 }
 0x2d3   : > { %v996_v23 = vpop.permute.xlu0 %995 }
 0x2d4   : > { %v685_v27 = vsel %vm599_vm2, %v684_v20, 0.0  ;;  %v1000_v7 = vsel %vm999_vm8, %v996_v23, %v998_v13  ;;  %v1001_v28 = vsel %vm999_vm8, %v998_v13, %v996_v23  ;;  %v1111_v20 = vld [vmem:[%s3243_s8] sm:$0xf]  ;;  %v2449_v23 = vld [vmem:[%s3237_s2 + $0x4] ss:$8 sps:$4 sm:$0xff]  }
 0x2d5   : > { %686 = vadd.xlane.f32.xlu1 %v685_v27  ;;  %v1015_v29 = vmul.f32 %v1008_v18, %v1000_v7  ;;  %v1016_v30 = vmul.f32 %v1012_v19, %v1001_v28  ;;  %833 = vmatprep.subr.bf16.mxu0 %v2449_v23  ;;  %v2450_v27 = vld [vmem:[%s3237_s2 + $0x10] ss:$8 sps:$4 sm:$0xff]  }
 0x2d6   : > { %834 = vmatpush1.bf16.msra.mxu0 %v2447_v21 }
 0x2d7   : > { %v1054_v34 = vpop.permute.xlu0 %1053  ;;  %v1017_v35 = vpack.c.bf16 %v1015_v29, %v1015_v29  ;;  %v1018_v36 = vpack.c.bf16 %v1016_v30, %v1016_v30 }
 0x2d8   : > { %v1058_v37 = vsel %vm1057_vm9, %v1054_v34, %v1056_v24  ;;  %v1059_v38 = vsel %vm1057_vm9, %v1056_v24, %v1054_v34  ;;  %v2452_v24 = vld [vmem:[%s3237_s2 + $0x14] ss:$8 sps:$4 sm:$0xff]   ;;  %v774_v34 = vld [vmem:[%s3242_s7] sm:$0xff] }
 0x2d9   : > { %v1021_v41 = vrot.slane %v1017_v35, 4  ;;  %v1022_v42 = vrot.slane %v1018_v36, 4  ;;  %v1073_v43 = vmul.f32 %v1066_v31, %v1058_v37  ;;  %v1074_v44 = vmul.f32 %v1070_v32, %v1059_v38  ;;  %835 = vmatprep.subr.bf16.mxu0 %v2452_v24  ;;  %v2455_v31 = vld [vmem:[%s3237_s2 + $0x24] ss:$8 sps:$4 sm:$0xff]   ;;  %v2458_v35 = vld [vmem:[%s3237_s2 + $0x34] ss:$8 sps:$4 sm:$0xff]  }
 0x2da   : > { %836 = vmatpush1.bf16.msra.mxu0 %v2450_v27  ;;  %v2456_v36 = vld [vmem:[%s3237_s2 + $0x30] ss:$8 sps:$4 sm:$0xff]   ;;  %v2459_v24 = vld [vmem:[%s3247_s12 + $0x4] ss:$8 sps:$4 sm:$0xff]  }
 0x2db   : > { %v1028_v46 = vpop.permute.xlu0 %1027  ;;  %1025 = vst [vmem:[#allocation2 + $0x20] sm:$0xf0] %v1021_v41  ;;  %1026 = vst [vmem:[#allocation2 + $0x28] sm:$0xf0] %v1022_v42  ;;  %v1075_v47 = vpack.c.bf16 %v1073_v43, %v1073_v43  ;;  %v1076_v48 = vpack.c.bf16 %v1074_v44, %v1074_v44  ;;  %837 = vmatprep.subr.bf16.mxu0 %v2455_v31 }
 0x2dc   : > { %v1032_v49 = vsel %vm1031_vm10, %v1028_v46, %v1030_v45  ;;  %v1033_v50 = vsel %vm1031_vm10, %v1030_v45, %v1028_v46 }
 0x2dd   : > { %v1079_v51 = vrot.slane %v1075_v47, 4  ;;  %v1080_v52 = vrot.slane %v1076_v48, 4  ;;  %v1047_v53 = vmul.f32 %v1040_v39, %v1032_v49  ;;  %v1048_v54 = vmul.f32 %v1044_v40, %v1033_v50 }
 0x2de   : > { %838 = vmatpush1.bf16.msra.mxu0 %v2453_v33 }
 0x2df   : > { %1083 = vst [vmem:[#allocation2 + $0x30] sm:$0xf0] %v1079_v51  ;;  %1084 = vst [vmem:[#allocation2 + $0x38] sm:$0xf0] %v1080_v52  ;;  %v1049_v55 = vpack.c.bf16 %v1047_v53, %v1047_v53  ;;  %v1050_v56 = vpack.c.bf16 %v1048_v54, %v1048_v54  ;;  %v1086_v63 = vpop.permute.xlu0 %1085  ;;  %839 = vmatprep.subr.bf16.mxu0 %v2458_v35 }
 0x2e1   : > { %1051 = vst [vmem:[#allocation2 + $0x30] sm:$0xf] %v1049_v55  ;;  %1052 = vst [vmem:[#allocation2 + $0x38] sm:$0xf] %v1050_v56 }
 0x2e2   : > { %v1117_v9 = vld [vmem:[#allocation2 + $0x28] sm:$0xff]  ;;  %840 = vmatpush1.bf16.msra.mxu0 %v2456_v36 }
 0x2e3   : > { %v1126_v37 = vpop.permute.xlu0 %1125  ;;  %2405 = vmatprep.subr.mxu0 %v2503_v0 }
 0x2e6   : > { %1087 = vrot.lane.b32.xlu1 %v2625_v2, %s3255_s0  ;;  %v1115_v2 = vld [vmem:[#allocation2 + $0x18] sm:$0xff] }
 0x2e7   : > { %v771_v47 = vpop.permute.xlu0 %770 }
 0x2e8   : > { %v1119_v13 = vld [vmem:[#allocation2 + $0x38] sm:$0xff]  ;;  %v1118_v15 = vld [vmem:[#allocation2 + $0x30] sm:$0xff] }
 0x362   : > { %v687_v58 = vpop.xlane.xlu1 %686 }
 0x363   : > { %2401 = vmatpush3.msra.mxu1 %v687_v58 }
 0x364   : > { %2403 = vmatmul.mubr.msk.f32.vlgmr.msra.gmra.mrb[2].mxu1 %vm603_vm3, %v2640_v12  ;;  %1139 = vmatprep.subr.bf16.mxu1 %v1113_v59 }
 0x365   : > { %1140 = vmatpush1.bf16.msra.mxu1 %v1112_v60  ;;  %1171 = vmatprep.mubr.bf16.mxu1 %v2505_v14  ;;  %v1116_v14 = vld [vmem:[#allocation2 + $0x20] sm:$0xff] }
 0x366   : > { %1141 = vmatprep.subr.bf16.mxu1 %v1115_v2  ;;  %v1088_v1 = vpop.permute.xlu1 %1087 }
 0x367   : > { %v1090_v3 = vsel %vm1089_vm11, %v1086_v63, %v1088_v1  ;;  %v1091_v4 = vsel %vm1089_vm11, %v1088_v1, %v1086_v63  ;;  %v1346_v1 = vld [vmem:[%s3245_s10] sm:$0xff] }
 0x368   : > { %v1105_v5 = vmul.f32 %v1098_v61, %v1090_v3  ;;  %v1106_v6 = vmul.f32 %v1102_v62, %v1091_v4 }
 0x369   : > { %1142 = vmatpush1.bf16.msra.mxu1 %v1114_v8 }
 0x36a   : > { %v1107_v10 = vpack.c.bf16 %v1105_v5, %v1105_v5  ;;  %v1108_v11 = vpack.c.bf16 %v1106_v6, %v1106_v6  ;;  %1143 = vmatprep.subr.bf16.mxu1 %v1117_v9 }
 0x36c   : > { %1109 = vst [vmem:[#allocation2 + $0x40] sm:$0xf] %v1107_v10  ;;  %1110 = vst [vmem:[#allocation2 + $0x48] sm:$0xf] %v1108_v11  ;;  %v1354_v10 = vld [vmem:[%s3246_s11] sm:$0xff] }
 0x36d   : > { %1144 = vmatpush1.bf16.msra.mxu1 %v1116_v14 }
 0x36e   : > { %1145 = vmatprep.subr.bf16.mxu1 %v1119_v13 }
 0x371   : > { %1146 = vmatpush1.bf16.msra.mxu1 %v1118_v15 }
 0x373   : > { %v1121_v16 = vld [vmem:[#allocation2 + $0x48] sm:$0xf]  ;;  %v1120_v18 = vld [vmem:[#allocation2 + $0x40] sm:$0xf] }
 0x374   : > { %2344 = vmatprep.subr.msk.bf16.mxu1 %vm1132_vm12, %v1121_v16  ;;  %v1134_v19 = vsel %vm1132_vm12, %v1120_v18, 0 }
 0x375   : > { %1148 = vmatpush1.bf16.msra.mxu1 %v1134_v19 }
 0x378   : > { %2345 = vmatmul.mubr.msk.bf16.vlgmr.msra.gmra.mrb[4].mxu1 %vm1128_vm13, %v1111_v20 }
 0x379   : > { %2357 = vmatprep.mubr.msk.bf16.mxu1 %vm555_vm1, %v2459_v24  ;;  %v2350_v24 = vld [vmem:[%s3238_s3 + $0x6] sm:$0x3] }
 0x437   : > { %v754_v7 = vpop.f32.mrb[2].mxu1 }
 0x438   : > { %v758_v28 = vmul.f32 0.015625, %v754_v7  ;;  %v2404_v29 = vpop.f32.mrb[3].mxu1 }
 0x43a   : > { %v759_v30 = vadd.f32 1e-05, %v758_v28 }
 0x43c   : > { %2464 = vrsqrt.f32 %v759_v30 }
 0x446   : > { %v2465_v32 = vpop.eup %2464 }
 0x447   : > { %763 = vperm.xlu1 %2445, %v2465_v32   ;;  %v1374_v32 = vld [vmem:[%s3238_s3] sm:$0x3] }
 0x448   : > { %v1383_v35 = vrot.slane %v1374_v32, %v2685_v26 }
 0x44b   : > { %777 = vperm.xlu1 %2445, %v774_v34   ;;  %v1173_v38 = vpop.f32.mrb[4].mxu1  ;;  %v1379_v34 = vrot.slane %v1374_v32, %v2683_v25 }
 0x44c   : > { %v1174_v39 = vadd.f32 %v1173_v38, %v1126_v37  ;;  %v1175_v40 = vpop.f32.mrb[5].mxu1 }
 0x44d   : > { %v1176_v41 = vadd.f32 %v1175_v40, %v1126_v37  ;;  %v1177_v42 = vpop.f32.mrb[6].mxu1 }
 0x44e   : > { %v1178_v43 = vpop.f32.mrb[7].mxu1 }
 0x44f   : > { %v1180_v44 = vadd.f32 %v1176_v41, %v1174_v39 }
 0x451   : > { %1181 = vadd.xlane.f32.xlu0 %v1180_v44 }
 0x4c6   : > { %v764_v45 = vpop.permute.xlu1 %763 }
 0x4c7   : > { %v766_v46 = vmul.f32 %v764_v45, %v2728_v17 }
 0x4c9   : > { %v773_v48 = vmul.f32 %v771_v47, %v766_v46  ;;  %v2348_v46 = vld [vmem:[%s3238_s3 + $0x2] sm:$0x3] }
 0x4ca   : > { %v778_v49 = vpop.permute.xlu1 %777 }
 0x4cb   : > { %v780_v50 = vadd.f32 %v778_v49, %v773_v48 }
 0x4cd   : > { %v781_v51 = vpack.c.bf16 %v780_v50, %v780_v50 }
 0x4cf   : > { %2336 = vmatmul.mubr.msk.bf16.vlgmr.msra.gmra.mrb[4].mxu0 %vm599_vm2, %v781_v51  ;;  %v1411_v51 = vrot.slane %v2348_v46, %v2683_v25 }
 0x4d0   : > { %2407 = vmatprep.mubr.msk.f32.mxu0 %vm2504_vm0, %v2503_v0 }
 0x4de   : > { %v1182_v52 = vpop.xlane.xlu0 %1181 }
 0x4df   : > { %2406 = vmatpush3.msra.mxu0 %v1182_v52  ;;  %v1415_v52 = vrot.slane %v2348_v46, %v2685_v26 }
 0x4e0   : > { %2408 = vmatmul.mubr.msk.f32.vlgmr.msra.gmra.mrb[8].mxu0 %vm603_vm3, %v2640_v12  ;;  %2410 = vmatprep.subr.mxu0 %v2503_v0 }
 0x4e1   : > { %2412 = vmatprep.mubr.msk.f32.mxu0 %vm2504_vm0, %v2503_v0 }
 0x5a2   : > { %v2815_v17 = vpop.f32.mrb[4].mxu0 }
 0x5a3   : > { %v2817_v53 = vpop.f32.mrb[5].mxu0 }
 0x5a4   : > { %v871_v54 = vpop.f32.mrb[6].mxu0 }
 0x5a5   : > { %v872_v55 = vpop.f32.mrb[7].mxu0 }
 0x5b3   : > { %v1249_v56 = vpop.f32.mrb[8].mxu0 }
 0x5b4   : > { %v1253_v57 = vmul.f32 0.00390625, %v1249_v56  ;;  %v2409_v58 = vpop.f32.mrb[9].mxu0 }
 0x5b6   : > { %1256 = vperm.xlu1 %2445, %v1253_v57  }
 0x635   : > { %v1257_v59 = vpop.permute.xlu1 %1256 }
 0x636   : > { %v1259_v60 = vsub.f32 %v1174_v39, %v1257_v59  ;;  %v1260_v61 = vsub.f32 %v1176_v41, %v1257_v59 }
 0x638   : > { %v1261_v62 = vmul.f32 %v1259_v60, %v1259_v60  ;;  %v1262_v2 = vmul.f32 %v1260_v61, %v1260_v61 }
 0x63a   : > { %v1263_v63 = vadd.f32 %v1262_v2, %v1261_v62 }
 0x63c   : > { %1264 = vadd.xlane.f32.xlu1 %v1263_v63  ;;  %v2349_v63 = vld [vmem:[%s3238_s3 + $0x4] sm:$0x3] }
 0x64d   : > { %1349 = vperm.xlu1 %2445, %v1346_v1  }
 0x6c9   : > { %v1265_v3 = vpop.xlane.xlu1 %1264 }
 0x6ca   : > { %2411 = vmatpush3.msra.mxu0 %v1265_v3 }
 0x6cb   : > { %2413 = vmatmul.mubr.msk.f32.vlgmr.msra.gmra.mrb[10].mxu0 %vm603_vm3, %v2640_v12 }
 0x6cd   : > { %v1350_v13 = vpop.permute.xlu1 %1349 }
 0x79e   : > { %v1332_v4 = vpop.f32.mrb[10].mxu0 }
 0x79f   : > { %v1336_v5 = vmul.f32 0.00390625, %v1332_v4  ;;  %v2414_v6 = vpop.f32.mrb[11].mxu0 }
 0x7a0   : > { %v1447_v6 = vrot.slane %v2349_v63, %v2685_v26 }
 0x7a1   : > { %v1337_v8 = vadd.f32 1e-05, %v1336_v5  ;;  %v1443_v5 = vrot.slane %v2349_v63, %v2683_v25 }
 0x7a3   : > { %2466 = vrsqrt.f32 %v1337_v8 }
 0x7ad   : > { %v2467_v9 = vpop.eup %2466 }
 0x7ae   : > { %1341 = vperm.xlu0 %2444, %v2467_v9  }
 0x7b2   : > { %1357 = vperm.xlu0 %2444, %v1354_v10  }
 0x7b6   : > { %1362 = vrot.lane.b32.xlu0 %v2815_v17, %s2507_s25 }
 0x7ba   : > { %1366 = vrot.lane.b32.xlu0 %v2817_v53, %s2507_s25 }
 0x7be   : > { %1394 = vrot.lane.b32.xlu0 %v2815_v17, %s2506_s23 }
 0x7c2   : > { %1398 = vrot.lane.b32.xlu0 %v2817_v53, %s2506_s23 }
 0x7c6   : > { %1426 = vrot.lane.b32.xlu0 %v2815_v17, %s2509_s27 }
 0x7ca   : > { %1430 = vrot.lane.b32.xlu0 %v2817_v53, %s2509_s27 }
 0x7ce   : > { %1458 = vrot.lane.b32.xlu0 %v2815_v17, %s3265_s26 }
 0x7d2   : > { %1462 = vrot.lane.b32.xlu0 %v2817_v53, %s3265_s26 }
 0x7d6   : > { %1494 = vrot.lane.b32.xlu0 %v2815_v17, %s3266_s28 }
 0x7da   : > { %1498 = vrot.lane.b32.xlu0 %v2817_v53, %s3266_s28 }
 0x7de   : > { %1526 = vrot.lane.b32.xlu0 %v2815_v17, %s3267_s19 }
 0x7e2   : > { %1530 = vrot.lane.b32.xlu0 %v2817_v53, %s3267_s19 }
 0x7e6   : > { %1558 = vrot.lane.b32.xlu0 %v2815_v17, %s3268_s20 }
 0x7ea   : > { %1562 = vrot.lane.b32.xlu0 %v2817_v53, %s3268_s20 }
 0x7ee   : > { %1590 = vrot.lane.b32.xlu0 %v2815_v17, %s3269_s17 }
 0x7f2   : > { %1594 = vrot.lane.b32.xlu0 %v2817_v53, %s3269_s17 }
 0x82d   : > { %v1342_v12 = vpop.permute.xlu0 %1341 }
 0x82e   : > { %v1344_v11 = vmul.f32 %v1342_v12, %v1259_v60  ;;  %v1345_v14 = vmul.f32 %v1342_v12, %v1260_v61 }
 0x830   : > { %v1352_v15 = vmul.f32 %v1350_v13, %v1344_v11  ;;  %v1353_v16 = vmul.f32 %v1350_v13, %v1345_v14 }
 0x831   : > { %v1358_v18 = vpop.permute.xlu0 %1357 }
 0x832   : > { %v2859_v19 = vadd.f32 %v1358_v18, %v1352_v15  ;;  %v2861_v20 = vadd.f32 %v1358_v18, %v1353_v16 }
 0x834   : > { %1364 = vrot.lane.b32.xlu1 %v2859_v19, %s2507_s25  ;;  %v1491_v21 = vpack.c.bf16 %v2861_v20, %v2817_v53  ;;  %v1490_v23 = vpack.c.bf16 %v2859_v19, %v2815_v17 }
 0x835   : > { %v1363_v27 = vpop.permute.xlu0 %1362 }
 0x838   : > { %1368 = vrot.lane.b32.xlu1 %v2861_v20, %s2507_s25 }
 0x839   : > { %v1367_v7 = vpop.permute.xlu0 %1366 }
 0x83a   : > { %v1370_v37 = vsel %vm880_vm5, %v1363_v27, %v1367_v7  ;;  %v1372_v38 = vsel %vm880_vm5, %v1367_v7, %v1363_v27 }
 0x83b   : > { %v1386_v42 = vmul.f32 %v1379_v34, %v1372_v38  ;;  %v1387_v43 = vmul.f32 %v1383_v35, %v1370_v37 }
 0x83c   : > { %1396 = vrot.lane.b32.xlu1 %v2859_v19, %s2506_s23 }
 0x83d   : > { %v1395_v28 = vpop.permute.xlu0 %1394 }
 0x840   : > { %1400 = vrot.lane.b32.xlu1 %v2861_v20, %s2506_s23 }
 0x841   : > { %v1399_v29 = vpop.permute.xlu0 %1398 }
 0x842   : > { %v1402_v54 = vsel %vm905_vm4, %v1395_v28, %v1399_v29  ;;  %v1404_v55 = vsel %vm905_vm4, %v1399_v29, %v1395_v28  ;;  %v1475_v29 = vrot.slane %v2350_v24, %v2683_v25 }
 0x843   : > { %v1418_v59 = vmul.f32 %v1411_v51, %v1404_v55  ;;  %v1419_v60 = vmul.f32 %v1415_v52, %v1402_v54 }
 0x844   : > { %1428 = vrot.lane.b32.xlu1 %v2859_v19, %s2509_s27 }
 0x845   : > { %v1427_v30 = vpop.permute.xlu0 %1426 }
 0x848   : > { %1432 = vrot.lane.b32.xlu1 %v2861_v20, %s2509_s27 }
 0x849   : > { %v1431_v31 = vpop.permute.xlu0 %1430 }
 0x84a   : > { %v1434_v8 = vsel %vm937_vm7, %v1427_v30, %v1431_v31  ;;  %v1436_v9 = vsel %vm937_vm7, %v1431_v31, %v1427_v30  ;;  %v1479_v30 = vrot.slane %v2350_v24, %v2685_v26 }
 0x84b   : > { %v1450_v13 = vmul.f32 %v1443_v5, %v1436_v9  ;;  %v1451_v15 = vmul.f32 %v1447_v6, %v1434_v8 }
 0x84c   : > { %1460 = vrot.lane.b32.xlu1 %v2859_v19, %s3265_s26 }
 0x84d   : > { %v1459_v36 = vpop.permute.xlu0 %1458 }
 0x850   : > { %1464 = vrot.lane.b32.xlu1 %v2861_v20, %s3265_s26 }
 0x851   : > { %v1463_v47 = vpop.permute.xlu0 %1462 }
 0x852   : > { %v1466_v32 = vsel %vm963_vm6, %v1459_v36, %v1463_v47 }
 0x854   : > { %1496 = vrot.lane.b32.xlu1 %v2859_v19, %s3266_s28 }
 0x855   : > { %v1495_v61 = vpop.permute.xlu0 %1494 }
 0x858   : > { %1500 = vrot.lane.b32.xlu1 %v2861_v20, %s3266_s28 }
 0x859   : > { %v1499_v10 = vpop.permute.xlu0 %1498 }
 0x85c   : > { %1528 = vrot.lane.b32.xlu1 %v2859_v19, %s3267_s19 }
 0x85d   : > { %v1527_v31 = vpop.permute.xlu0 %1526 }
 0x860   : > { %1532 = vrot.lane.b32.xlu1 %v2861_v20, %s3267_s19 }
 0x864   : > { %1560 = vrot.lane.b32.xlu1 %v2859_v19, %s3268_s20 }
 0x868   : > { %1564 = vrot.lane.b32.xlu1 %v2861_v20, %s3268_s20 }
 0x86c   : > { %1592 = vrot.lane.b32.xlu1 %v2859_v19, %s3269_s17 }
 0x870   : > { %1596 = vrot.lane.b32.xlu1 %v2861_v20, %s3269_s17 }
 0x8a6   : > { %v1365_v33 = vpop.permute.xlu1 %1364 }
 0x8aa   : > { %v1369_v39 = vpop.permute.xlu1 %1368 }
 0x8ab   : > { %v1371_v40 = vsel %vm880_vm5, %v1365_v33, %v1369_v39  ;;  %v1373_v41 = vsel %vm880_vm5, %v1369_v39, %v1365_v33  ;;  %v1468_v33 = vsel %vm963_vm6, %v1463_v47, %v1459_v36  ;;  %v1483_v39 = vmul.f32 %v1479_v30, %v1466_v32 }
 0x8ac   : > { %v1388_v44 = vmul.f32 %v1379_v34, %v1373_v41  ;;  %v1389_v45 = vmul.f32 %v1383_v35, %v1371_v40  ;;  %v1482_v38 = vmul.f32 %v1475_v29, %v1468_v33 }
 0x8ae   : > { %v1390_v48 = vpack.c.bf16 %v1388_v44, %v1386_v42  ;;  %v1391_v49 = vpack.c.bf16 %v1389_v45, %v1387_v43  ;;  %v1397_v50 = vpop.permute.xlu1 %1396  ;;  %v2351_v42 = vld [vmem:[%s3238_s3 + $0xa] sm:$0x3]  ;;  %v1531_v43 = vpop.permute.xlu0 %1530 }
 0x8af   : > { %v1511_v46 = vrot.slane %v2351_v42, %v2683_v25  ;;  %v1515_v47 = vrot.slane %v2351_v42, %v2685_v26 }
 0x8b0   : > { %1654 = vmatprep.subr.bf16.mxu1 %v1391_v49  ;;  %v1504_v49 = vsel %vm999_vm8, %v1499_v10, %v1495_v61 }
 0x8b1   : > { %1655 = vmatpush1.bf16.msra.mxu1 %v1390_v48  ;;  %v1502_v48 = vsel %vm999_vm8, %v1495_v61, %v1499_v10  ;;  %v1519_v55 = vmul.f32 %v1515_v47, %v1504_v49 }
 0x8b2   : > { %v1401_v56 = vpop.permute.xlu1 %1400  ;;  %v1518_v54 = vmul.f32 %v1511_v46, %v1502_v48  ;;  %v2461_v48 = vld [vmem:[%s3247_s12] ss:$8 sps:$4 sm:$0xff]  }
 0x8b3   : > { %v1403_v57 = vsel %vm905_vm4, %v1397_v50, %v1401_v56  ;;  %v1405_v58 = vsel %vm905_vm4, %v1401_v56, %v1397_v50  ;;  %v1559_v56 = vpop.permute.xlu0 %1558 }
 0x8b4   : > { %v1420_v62 = vmul.f32 %v1411_v51, %v1405_v58  ;;  %v1421_v2 = vmul.f32 %v1415_v52, %v1403_v57 }
 0x8b6   : > { %v1422_v1 = vpack.c.bf16 %v1420_v62, %v1418_v59  ;;  %v1423_v3 = vpack.c.bf16 %v1421_v2, %v1419_v60  ;;  %v1429_v4 = vpop.permute.xlu1 %1428  ;;  %v2352_v59 = vld [vmem:[%s3238_s3 + $0xc] sm:$0x3]  ;;  %v1534_v62 = vsel %vm1031_vm10, %v1527_v31, %v1531_v43  ;;  %v1536_v2 = vsel %vm1031_vm10, %v1531_v43, %v1527_v31 }
 0x8b7   : > { %v1543_v60 = vrot.slane %v2352_v59, %v2683_v25  ;;  %v1547_v61 = vrot.slane %v2352_v59, %v2685_v26  ;;  %v1563_v63 = vpop.permute.xlu0 %1562 }
 0x8b8   : > { %1656 = vmatprep.subr.bf16.mxu1 %v1423_v3 }
 0x8b9   : > { %1657 = vmatpush1.bf16.msra.mxu1 %v1422_v1  ;;  %v1551_v3 = vmul.f32 %v1547_v61, %v1536_v2 }
 0x8ba   : > { %v1433_v12 = vpop.permute.xlu1 %1432 }
 0x8bb   : > { %v1435_v11 = vsel %vm937_vm7, %v1429_v4, %v1433_v12  ;;  %v1437_v14 = vsel %vm937_vm7, %v1433_v12, %v1429_v4 }
 0x8bc   : > { %v1452_v16 = vmul.f32 %v1443_v5, %v1437_v14  ;;  %v1453_v18 = vmul.f32 %v1447_v6, %v1435_v11  ;;  %v2353_v6 = vld [vmem:[%s3238_s3 + $0xe] sm:$0x3]  ;;  %v1591_v14 = vpop.permute.xlu0 %1590 }
 0x8bd   : > { %v1575_v12 = vrot.slane %v2353_v6, %v2683_v25  ;;  %v1579_v11 = vrot.slane %v2353_v6, %v2685_v26 }
 0x8be   : > { %v1454_v27 = vpack.c.bf16 %v1452_v16, %v1450_v13  ;;  %v1455_v7 = vpack.c.bf16 %v1453_v18, %v1451_v15  ;;  %v1461_v28 = vpop.permute.xlu1 %1460  ;;  %v1566_v13 = vsel %vm1057_vm9, %v1559_v56, %v1563_v63  ;;  %v1568_v15 = vsel %vm1057_vm9, %v1563_v63, %v1559_v56 }
 0x8c0   : > { %1658 = vmatprep.subr.bf16.mxu1 %v1455_v7  ;;  %v1583_v7 = vmul.f32 %v1579_v11, %v1568_v15  ;;  %v1595_v31 = vpop.permute.xlu0 %1594 }
 0x8c1   : > { %1659 = vmatpush1.bf16.msra.mxu1 %v1454_v27  ;;  %v1582_v27 = vmul.f32 %v1575_v12, %v1566_v13 }
 0x8c2   : > { %v1465_v34 = vpop.permute.xlu1 %1464 }
 0x8c3   : > { %v1467_v35 = vsel %vm963_vm6, %v1461_v28, %v1465_v34  ;;  %v1469_v37 = vsel %vm963_vm6, %v1465_v34, %v1461_v28 }
 0x8c4   : > { %v1484_v40 = vmul.f32 %v1475_v29, %v1469_v37  ;;  %v1485_v41 = vmul.f32 %v1479_v30, %v1467_v35  ;;  %v2354_v30 = vld [vmem:[%s3238_s3 + $0x10] sm:$0x3] }
 0x8c5   : > { %v1607_v35 = vrot.slane %v2354_v30, %v2683_v25  ;;  %v1611_v37 = vrot.slane %v2354_v30, %v2685_v26 }
 0x8c6   : > { %v1486_v44 = vpack.c.bf16 %v1484_v40, %v1482_v38  ;;  %v1487_v45 = vpack.c.bf16 %v1485_v41, %v1483_v39  ;;  %v1497_v36 = vpop.permute.xlu1 %1496  ;;  %v1598_v38 = vsel %vm1089_vm11, %v1591_v14, %v1595_v31  ;;  %v1600_v39 = vsel %vm1089_vm11, %v1595_v31, %v1591_v14 }
 0x8c7   : > { %v1614_v43 = vmul.f32 %v1607_v35, %v1598_v38 }
 0x8c8   : > { %1660 = vmatprep.subr.bf16.mxu1 %v1487_v45 }
 0x8c9   : > { %1661 = vmatpush1.bf16.msra.mxu1 %v1486_v44  ;;  %v1615_v44 = vmul.f32 %v1611_v37, %v1600_v39 }
 0x8ca   : > { %v1501_v50 = vpop.permute.xlu1 %1500  ;;  %1662 = vmatprep.subr.bf16.mxu1 %v1491_v21 }
 0x8cb   : > { %v1503_v51 = vsel %vm999_vm8, %v1497_v36, %v1501_v50  ;;  %v1505_v52 = vsel %vm999_vm8, %v1501_v50, %v1497_v36 }
 0x8cc   : > { %v1520_v57 = vmul.f32 %v1511_v46, %v1503_v51  ;;  %v1521_v58 = vmul.f32 %v1515_v47, %v1505_v52 }
 0x8cd   : > { %1663 = vmatpush1.bf16.msra.mxu1 %v1490_v23  ;;  %v1550_v23 = vmul.f32 %v1543_v60, %v1534_v62 }
 0x8ce   : > { %v1522_v53 = vpack.c.bf16 %v1520_v57, %v1518_v54  ;;  %v1523_v20 = vpack.c.bf16 %v1521_v58, %v1519_v55  ;;  %v1529_v21 = vpop.permute.xlu1 %1528 }
 0x8d0   : > { %1664 = vmatprep.subr.bf16.mxu1 %v1523_v20 }
 0x8d1   : > { %1665 = vmatpush1.bf16.msra.mxu1 %v1522_v53 }
 0x8d2   : > { %v1533_v1 = vpop.permute.xlu1 %1532 }
 0x8d3   : > { %v1535_v17 = vsel %vm1031_vm10, %v1529_v21, %v1533_v1  ;;  %v1537_v19 = vsel %vm1031_vm10, %v1533_v1, %v1529_v21 }
 0x8d4   : > { %v1552_v4 = vmul.f32 %v1543_v60, %v1535_v17  ;;  %v1553_v5 = vmul.f32 %v1547_v61, %v1537_v19 }
 0x8d6   : > { %v1554_v8 = vpack.c.bf16 %v1552_v4, %v1550_v23  ;;  %v1555_v9 = vpack.c.bf16 %v1553_v5, %v1551_v3  ;;  %v1561_v10 = vpop.permute.xlu1 %1560 }
 0x8d8   : > { %1666 = vmatprep.subr.bf16.mxu1 %v1555_v9 }
 0x8d9   : > { %1667 = vmatpush1.bf16.msra.mxu1 %v1554_v8 }
 0x8da   : > { %v1565_v16 = vpop.permute.xlu1 %1564 }
 0x8db   : > { %v1567_v18 = vsel %vm1057_vm9, %v1561_v10, %v1565_v16  ;;  %v1569_v24 = vsel %vm1057_vm9, %v1565_v16, %v1561_v10 }
 0x8dc   : > { %v1584_v28 = vmul.f32 %v1575_v12, %v1567_v18  ;;  %v1585_v29 = vmul.f32 %v1579_v11, %v1569_v24  ;;  %v3056_v11 = vld [vmem:[%s3248_s13] sm:$0xff] }
 0x8dd   : > { %v2366_v14 = vcombine.high %v3056_v11, %v3056_v11 }
 0x8de   : > { %v1586_v32 = vpack.c.bf16 %v1584_v28, %v1582_v27  ;;  %v1587_v33 = vpack.c.bf16 %v1585_v29, %v1583_v7  ;;  %v1593_v34 = vpop.permute.xlu1 %1592 }
 0x8df   : > { %2367 = vmatprep.mubr.msk.bf16.mxu0 %vm555_vm1, %v2366_v14 }
 0x8e0   : > { %1668 = vmatprep.subr.bf16.mxu1 %v1587_v33 }
 0x8e1   : > { %1669 = vmatpush1.bf16.msra.mxu1 %v1586_v32 }
 0x8e2   : > { %v1597_v40 = vpop.permute.xlu1 %1596 }
 0x8e3   : > { %v1599_v41 = vsel %vm1089_vm11, %v1593_v34, %v1597_v40  ;;  %v1601_v42 = vsel %vm1089_vm11, %v1597_v40, %v1593_v34  ;;  %v1733_v34 = vld [vmem:[%s3238_s3] sm:$0x3]  ;;  %v2358_v40 = vld [vmem:[%s3238_s3 + $0x2] sm:$0x3] }
 0x8e4   : > { %v1616_v45 = vmul.f32 %v1607_v35, %v1599_v41  ;;  %v1617_v36 = vmul.f32 %v1611_v37, %v1601_v42  ;;  %v1738_v37 = vrot.slane %v1733_v34, %v2683_v25  ;;  %v1742_v38 = vrot.slane %v1733_v34, %v2685_v26 }
 0x8e6   : > { %v1618_v46 = vpack.c.bf16 %v1616_v45, %v1614_v43  ;;  %v1619_v47 = vpack.c.bf16 %v1617_v36, %v1615_v44  ;;  %v1770_v36 = vrot.slane %v2358_v40, %v2683_v25 }
 0x8e8   : > { %1670 = vmatprep.subr.bf16.mxu1 %v1619_v47 }
 0x8e9   : > { %1671 = vmatpush1.bf16.msra.mxu1 %v1618_v46  ;;  %v1774_v46 = vrot.slane %v2358_v40, %v2685_v26 }
 0x8ea   : > { %2415 = vmatprep.subr.mxu1 %v2503_v0 }
 0x8ec   : > { %1687 = vmatmul.mubr.bf16.vlgmr.msra.gmra.mrb[8].mxu1 %v2461_v48 }
 0x8ed   : > { %2417 = vmatprep.mubr.msk.f32.mxu1 %vm2504_vm0, %v2503_v0 }
 0x9bf   : > { %v1688_v49 = vpop.f32.mrb[8].mxu1 }
 0x9c0   : > { %v1697_v50 = vsub.f32 0.0, %v1688_v49  ;;  %v1690_v51 = vpop.f32.mrb[9].mxu1 }
 0x9c1   : > { %v1698_v52 = vsub.f32 0.0, %v1690_v51  ;;  %v1692_v54 = vpop.f32.mrb[10].mxu1 }
 0x9c2   : > { %v1701_v55 = vmul.f32 1.442695, %v1697_v50  ;;  %v1699_v56 = vsub.f32 0.0, %v1692_v54  ;;  %v1694_v57 = vpop.f32.mrb[11].mxu1 }
 0x9c3   : > { %v1703_v58 = vmul.f32 1.442695, %v1698_v52  ;;  %v1700_v59 = vsub.f32 0.0, %v1694_v57  ;;  %v2359_v52 = vld [vmem:[%s3238_s3 + $0x4] sm:$0x3] }
 0x9c4   : > { %2468 = vpow2.f32 %v1701_v55  ;;  %v1705_v53 = vmul.f32 1.442695, %v1699_v56 }
 0x9c5   : > { %2470 = vpow2.f32 %v1703_v58  ;;  %v1707_v20 = vmul.f32 1.442695, %v1700_v59 }
 0x9c6   : > { %2472 = vpow2.f32 %v1705_v53 }
 0x9c7   : > { %2474 = vpow2.f32 %v1707_v20  ;;  %v1802_v20 = vrot.slane %v2359_v52, %v2683_v25 }
 0x9ce   : > { %v2469_v21 = vpop.eup %2468 }
 0x9cf   : > { %v2471_v60 = vpop.eup %2470  ;;  %v1709_v61 = vadd.f32 1.0, %v2469_v21  ;;  %v1806_v21 = vrot.slane %v2359_v52, %v2685_v26 }
 0x9d0   : > { %v2473_v62 = vpop.eup %2472  ;;  %v1710_v2 = vadd.f32 1.0, %v2471_v60 }
 0x9d1   : > { %v2475_v63 = vpop.eup %2474  ;;  %2476 = vrcp.f32 %v1709_v61  ;;  %v1711_v1 = vadd.f32 1.0, %v2473_v62 }
 0x9d2   : > { %2478 = vrcp.f32 %v1710_v2  ;;  %v1712_v17 = vadd.f32 1.0, %v2475_v63 }
 0x9d3   : > { %2480 = vrcp.f32 %v1711_v1  ;;  %v2360_v1 = vld [vmem:[%s3238_s3 + $0x6] sm:$0x3] }
 0x9d4   : > { %2482 = vrcp.f32 %v1712_v17 }
 0x9db   : > { %v2477_v19 = vpop.eup %2476 }
 0x9dc   : > { %v2479_v23 = vpop.eup %2478  ;;  %v1717_v3 = vmul.f32 %v2477_v19, %v1688_v49 }
 0x9dd   : > { %v2481_v4 = vpop.eup %2480  ;;  %v1718_v8 = vmul.f32 %v2479_v23, %v1690_v51 }
 0x9de   : > { %v2483_v5 = vpop.eup %2482  ;;  %v1719_v6 = vmul.f32 %v2481_v4, %v1692_v54  ;;  %1721 = vrot.lane.b32.xlu0 %v1717_v3, %s2507_s25 }
 0x9df   : > { %v1720_v9 = vmul.f32 %v2483_v5, %v1694_v57 }
 0x9e0   : > { %1723 = vrot.lane.b32.xlu1 %v1719_v6, %s2507_s25  ;;  %v3021_v10 = vpack.c.bf16 %v1719_v6, %v1717_v3 }
 0x9e1   : > { %v3023_v12 = vpack.c.bf16 %v1720_v9, %v1718_v8 }
 0x9e2   : > { %1753 = vrot.lane.b32.xlu0 %v1717_v3, %s2506_s23  ;;  %1851 = vst [vmem:[#allocation2 + $0x40] sm:$0xff] %v3021_v10 }
 0x9e3   : > { %1852 = vst [vmem:[#allocation2 + $0x48] sm:$0xff] %v3023_v12 }
 0x9e4   : > { %1755 = vrot.lane.b32.xlu1 %v1719_v6, %s2506_s23 }
 0x9e6   : > { %1785 = vrot.lane.b32.xlu0 %v1717_v3, %s2509_s27 }
 0x9e8   : > { %1787 = vrot.lane.b32.xlu1 %v1719_v6, %s2509_s27 }
 0x9ea   : > { %1817 = vrot.lane.b32.xlu0 %v1717_v3, %s3265_s26 }
 0x9ec   : > { %1819 = vrot.lane.b32.xlu1 %v1719_v6, %s3265_s26 }
 0x9ee   : > { %1853 = vrot.lane.b32.xlu0 %v1717_v3, %s3266_s28 }
 0x9f0   : > { %1855 = vrot.lane.b32.xlu1 %v1719_v6, %s3266_s28 }
 0x9f2   : > { %1885 = vrot.lane.b32.xlu0 %v1717_v3, %s3267_s19 }
 0x9f4   : > { %1887 = vrot.lane.b32.xlu1 %v1719_v6, %s3267_s19 }
 0x9f6   : > { %1917 = vrot.lane.b32.xlu0 %v1717_v3, %s3268_s20 }
 0x9f8   : > { %1919 = vrot.lane.b32.xlu1 %v1719_v6, %s3268_s20 }
 0x9fa   : > { %1725 = vrot.lane.b32.xlu0 %v1718_v8, %s2507_s25 }
 0x9fc   : > { %1727 = vrot.lane.b32.xlu1 %v1720_v9, %s2507_s25  ;;  %s541_s25 = scalar_lea.vmem %s3251_s16, %s3270_s30 }
 0x9fe   : > { %1757 = vrot.lane.b32.xlu0 %v1718_v8, %s2506_s23 }
 0xa00   : > { %1759 = vrot.lane.b32.xlu1 %v1720_v9, %s2506_s23 }
 0xa02   : > { %1789 = vrot.lane.b32.xlu0 %v1718_v8, %s2509_s27 }
 0xa04   : > { %1791 = vrot.lane.b32.xlu1 %v1720_v9, %s2509_s27 }
 0xa06   : > { %1821 = vrot.lane.b32.xlu0 %v1718_v8, %s3265_s26 }
 0xa08   : > { %1823 = vrot.lane.b32.xlu1 %v1720_v9, %s3265_s26 }
 0xa0a   : > { %1949 = vrot.lane.b32.xlu0 %v1717_v3, %s3269_s17 }
 0xa0c   : > { %1951 = vrot.lane.b32.xlu1 %v1719_v6, %s3269_s17 }
 0xa0e   : > { %1857 = vrot.lane.b32.xlu0 %v1718_v8, %s3266_s28 }
 0xa10   : > { %1859 = vrot.lane.b32.xlu1 %v1720_v9, %s3266_s28 }
 0xa12   : > { %1889 = vrot.lane.b32.xlu0 %v1718_v8, %s3267_s19 }
 0xa14   : > { %1891 = vrot.lane.b32.xlu1 %v1720_v9, %s3267_s19 }
 0xa16   : > { %1921 = vrot.lane.b32.xlu0 %v1718_v8, %s3268_s20 }
 0xa18   : > { %1923 = vrot.lane.b32.xlu1 %v1720_v9, %s3268_s20 }
 0xa1a   : > { %1953 = vrot.lane.b32.xlu0 %v1718_v8, %s3269_s17  ;;  %v1834_v8 = vrot.slane %v2360_v1, %v2683_v25 }
 0xa1c   : > { %1955 = vrot.lane.b32.xlu1 %v1720_v9, %s3269_s17  ;;  %v1838_v9 = vrot.slane %v2360_v1, %v2685_v26 }
 0xa50   : > { %v1722_v13 = vpop.permute.xlu0 %1721 }
 0xa52   : > { %v1724_v15 = vpop.permute.xlu1 %1723 }
 0xa54   : > { %v1754_v16 = vpop.permute.xlu0 %1753 }
 0xa56   : > { %v1756_v18 = vpop.permute.xlu1 %1755 }
 0xa58   : > { %v1786_v24 = vpop.permute.xlu0 %1785 }
 0xa5a   : > { %v1788_v27 = vpop.permute.xlu1 %1787 }
 0xa5c   : > { %v3065_v7 = vpop.permute.xlu0 %1817 }
 0xa5e   : > { %v3067_v28 = vpop.permute.xlu1 %1819 }
 0xa60   : > { %v3069_v29 = vpop.permute.xlu0 %1853 }
 0xa62   : > { %v3071_v30 = vpop.permute.xlu1 %1855 }
 0xa64   : > { %v3073_v31 = vpop.permute.xlu0 %1885 }
 0xa66   : > { %v3075_v32 = vpop.permute.xlu1 %1887 }
 0xa68   : > { %v3077_v33 = vpop.permute.xlu0 %1917 }
 0xa6a   : > { %v3082_v35 = vpop.permute.xlu1 %1919 }
 0xa6c   : > { %v1726_v39 = vpop.permute.xlu0 %1725 }
 0xa6d   : > { %v1729_v41 = vsel %vm880_vm5, %v1722_v13, %v1726_v39  ;;  %v1731_v42 = vsel %vm880_vm5, %v1726_v39, %v1722_v13 }
 0xa6e   : > { %v1728_v43 = vpop.permute.xlu1 %1727  ;;  %v1745_v47 = vmul.f32 %v1738_v37, %v1731_v42  ;;  %v1746_v48 = vmul.f32 %v1742_v38, %v1729_v41 }
 0xa6f   : > { %v1730_v44 = vsel %vm880_vm5, %v1724_v15, %v1728_v43  ;;  %v1732_v45 = vsel %vm880_vm5, %v1728_v43, %v1724_v15 }
 0xa70   : > { %v1747_v49 = vmul.f32 %v1738_v37, %v1732_v45  ;;  %v1748_v50 = vmul.f32 %v1742_v38, %v1730_v44  ;;  %v1758_v51 = vpop.permute.xlu0 %1757 }
 0xa71   : > { %v1761_v54 = vsel %vm905_vm4, %v1754_v16, %v1758_v51  ;;  %v1763_v55 = vsel %vm905_vm4, %v1758_v51, %v1754_v16 }
 0xa72   : > { %v1749_v56 = vpack.c.bf16 %v1747_v49, %v1745_v47  ;;  %v1750_v57 = vpack.c.bf16 %v1748_v50, %v1746_v48  ;;  %v1760_v58 = vpop.permute.xlu1 %1759  ;;  %v1777_v60 = vmul.f32 %v1770_v36, %v1763_v55  ;;  %v1778_v61 = vmul.f32 %v1774_v46, %v1761_v54  ;;  %v2362_v50 = vld [vmem:[%s3238_s3 + $0xc] sm:$0x3] }
 0xa73   : > { %v1762_v59 = vsel %vm905_vm4, %v1756_v18, %v1760_v58  ;;  %v1764_v53 = vsel %vm905_vm4, %v1760_v58, %v1756_v18  ;;  %v1906_v58 = vrot.slane %v2362_v50, %v2685_v26 }
 0xa74   : > { %1751 = vst [vmem:[#allocation2] sm:$0xff] %v1749_v56  ;;  %1752 = vst [vmem:[#allocation2 + $0x8] sm:$0xff] %v1750_v57  ;;  %v1779_v62 = vmul.f32 %v1770_v36, %v1764_v53  ;;  %v1780_v2 = vmul.f32 %v1774_v46, %v1762_v59  ;;  %v1790_v63 = vpop.permute.xlu0 %1789  ;;  %2009 = vmatprep.subr.bf16.mxu0 %v1750_v57  ;;  %v1902_v57 = vrot.slane %v2362_v50, %v2683_v25 }
 0xa75   : > { %v1793_v17 = vsel %vm937_vm7, %v1786_v24, %v1790_v63  ;;  %v1795_v19 = vsel %vm937_vm7, %v1790_v63, %v1786_v24  ;;  %2010 = vmatpush1.bf16.msra.mxu0 %v1749_v56 }
 0xa76   : > { %v1781_v23 = vpack.c.bf16 %v1779_v62, %v1777_v60  ;;  %v1782_v3 = vpack.c.bf16 %v1780_v2, %v1778_v61  ;;  %v1792_v4 = vpop.permute.xlu1 %1791  ;;  %v1809_v14 = vmul.f32 %v1802_v20, %v1795_v19  ;;  %v1810_v13 = vmul.f32 %v1806_v21, %v1793_v17 }
 0xa77   : > { %v1794_v5 = vsel %vm937_vm7, %v1788_v27, %v1792_v4  ;;  %v1796_v6 = vsel %vm937_vm7, %v1792_v4, %v1788_v27 }
 0xa78   : > { %1783 = vst [vmem:[#allocation2 + $0x10] sm:$0xff] %v1781_v23  ;;  %1784 = vst [vmem:[#allocation2 + $0x18] sm:$0xff] %v1782_v3  ;;  %v1811_v15 = vmul.f32 %v1802_v20, %v1796_v6  ;;  %v1812_v16 = vmul.f32 %v1806_v21, %v1794_v5  ;;  %v1822_v18 = vpop.permute.xlu0 %1821  ;;  %2011 = vmatprep.subr.bf16.mxu0 %v1782_v3  ;;  %v2364_v5 = vld [vmem:[%s3238_s3 + $0x10] sm:$0x3] }
 0xa79   : > { %v1825_v24 = vsel %vm963_vm6, %v3065_v7, %v1822_v18  ;;  %v1827_v27 = vsel %vm963_vm6, %v1822_v18, %v3065_v7  ;;  %2012 = vmatpush1.bf16.msra.mxu0 %v1781_v23  ;;  %v2361_v7 = vld [vmem:[%s3238_s3 + $0xa] sm:$0x3]  ;;  %v1970_v18 = vrot.slane %v2364_v5, %v2685_v26 }
 0xa7a   : > { %v1813_v34 = vpack.c.bf16 %v1811_v15, %v1809_v14  ;;  %v1814_v37 = vpack.c.bf16 %v1812_v16, %v1810_v13  ;;  %v1824_v38 = vpop.permute.xlu1 %1823  ;;  %v1841_v41 = vmul.f32 %v1834_v8, %v1827_v27  ;;  %v1842_v42 = vmul.f32 %v1838_v9, %v1825_v24 }
 0xa7b   : > { %v1826_v39 = vsel %vm963_vm6, %v3067_v28, %v1824_v38  ;;  %v1828_v40 = vsel %vm963_vm6, %v1824_v38, %v3067_v28  ;;  %v1870_v28 = vrot.slane %v2361_v7, %v2683_v25  ;;  %v1874_v48 = vrot.slane %v2361_v7, %v2685_v26 }
 0xa7c   : > { %1815 = vst [vmem:[#allocation2 + $0x20] sm:$0xff] %v1813_v34  ;;  %1816 = vst [vmem:[#allocation2 + $0x28] sm:$0xff] %v1814_v37  ;;  %v1843_v43 = vmul.f32 %v1834_v8, %v1828_v40  ;;  %v1844_v44 = vmul.f32 %v1838_v9, %v1826_v39  ;;  %v3137_v45 = vpop.permute.xlu0 %1949  ;;  %2013 = vmatprep.subr.bf16.mxu0 %v1814_v37  ;;  %v1966_v16 = vrot.slane %v2364_v5, %v2683_v25 }
 0xa7d   : > { %2014 = vmatpush1.bf16.msra.mxu0 %v1813_v34 }
 0xa7e   : > { %v1845_v36 = vpack.c.bf16 %v1843_v43, %v1841_v41  ;;  %v1846_v46 = vpack.c.bf16 %v1844_v44, %v1842_v42  ;;  %v3142_v47 = vpop.permute.xlu1 %1951 }
 0xa80   : > { %1847 = vst [vmem:[#allocation2 + $0x30] sm:$0xff] %v1845_v36  ;;  %1848 = vst [vmem:[#allocation2 + $0x38] sm:$0xff] %v1846_v46  ;;  %v1858_v49 = vpop.permute.xlu0 %1857  ;;  %2015 = vmatprep.subr.bf16.mxu0 %v1846_v46  ;;  %v2365_v46 = vcombine.low %v3056_v11, %v3056_v11 }
 0xa81   : > { %v1861_v51 = vsel %vm999_vm8, %v3069_v29, %v1858_v49  ;;  %v1863_v52 = vsel %vm999_vm8, %v1858_v49, %v3069_v29  ;;  %2016 = vmatpush1.bf16.msra.mxu0 %v1845_v36 }
 0xa82   : > { %v1860_v54 = vpop.permute.xlu1 %1859  ;;  %2017 = vmatprep.subr.bf16.mxu0 %v3023_v12  ;;  %v1877_v59 = vmul.f32 %v1870_v28, %v1861_v51  ;;  %v1878_v53 = vmul.f32 %v1874_v48, %v1863_v52  ;;  %v2363_v12 = vld [vmem:[%s3238_s3 + $0xe] sm:$0x3]  ;;  %v2494_v51 = vld [vmem:[%s3239_s4] sm:$0xff] }
 0xa83   : > { %v1862_v55 = vsel %vm999_vm8, %v3071_v30, %v1860_v54  ;;  %v1864_v56 = vsel %vm999_vm8, %v1860_v54, %v3071_v30  ;;  %v1934_v17 = vrot.slane %v2363_v12, %v2683_v25  ;;  %v1938_v19 = vrot.slane %v2363_v12, %v2685_v26 }
 0xa84   : > { %v1879_v20 = vmul.f32 %v1870_v28, %v1862_v55  ;;  %v1880_v29 = vmul.f32 %v1874_v48, %v1864_v56  ;;  %v1890_v21 = vpop.permute.xlu0 %1889 }
 0xa85   : > { %v1893_v60 = vsel %vm1031_vm10, %v3073_v31, %v1890_v21  ;;  %v1895_v30 = vsel %vm1031_vm10, %v1890_v21, %v3073_v31  ;;  %2018 = vmatpush1.bf16.msra.mxu0 %v3021_v10 }
 0xa86   : > { %v1881_v61 = vpack.c.bf16 %v1879_v20, %v1877_v59  ;;  %v1882_v62 = vpack.c.bf16 %v1880_v29, %v1878_v53  ;;  %v1892_v2 = vpop.permute.xlu1 %1891  ;;  %v1909_v23 = vmul.f32 %v1902_v57, %v1893_v60  ;;  %v1910_v3 = vmul.f32 %v1906_v58, %v1895_v30  ;;  %v2216_v20 = vld [vmem:[%s3249_s14] sm:$0xff] }
 0xa87   : > { %v1894_v63 = vsel %vm1031_vm10, %v3075_v32, %v1892_v2  ;;  %v1896_v1 = vsel %vm1031_vm10, %v1892_v2, %v3075_v32 }
 0xa88   : > { %v1911_v31 = vmul.f32 %v1902_v57, %v1894_v63  ;;  %v1912_v4 = vmul.f32 %v1906_v58, %v1896_v1  ;;  %v1922_v10 = vpop.permute.xlu0 %1921  ;;  %2019 = vmatprep.subr.bf16.mxu0 %v1882_v62 }
 0xa89   : > { %v1925_v6 = vsel %vm1057_vm9, %v3077_v33, %v1922_v10  ;;  %v1927_v32 = vsel %vm1057_vm9, %v1922_v10, %v3077_v33  ;;  %2020 = vmatpush1.bf16.msra.mxu0 %v1881_v61  ;;  %v2224_v61 = vld [vmem:[%s3250_s15] sm:$0xff] }
 0xa8a   : > { %v1913_v8 = vpack.c.bf16 %v1911_v31, %v1909_v23  ;;  %v1914_v9 = vpack.c.bf16 %v1912_v4, %v1910_v3  ;;  %v1924_v14 = vpop.permute.xlu1 %1923  ;;  %v1941_v24 = vmul.f32 %v1934_v17, %v1925_v6  ;;  %v1942_v27 = vmul.f32 %v1938_v19, %v1927_v32 }
 0xa8b   : > { %v1926_v13 = vsel %vm1057_vm9, %v3082_v35, %v1924_v14  ;;  %v1928_v15 = vsel %vm1057_vm9, %v1924_v14, %v3082_v35 }
 0xa8c   : > { %v1943_v34 = vmul.f32 %v1934_v17, %v1926_v13  ;;  %v1944_v33 = vmul.f32 %v1938_v19, %v1928_v15  ;;  %v1954_v37 = vpop.permute.xlu0 %1953  ;;  %2021 = vmatprep.subr.bf16.mxu0 %v1914_v9 }
 0xa8d   : > { %v1957_v38 = vsel %vm1089_vm11, %v3137_v45, %v1954_v37  ;;  %v1959_v39 = vsel %vm1089_vm11, %v1954_v37, %v3137_v45  ;;  %2022 = vmatpush1.bf16.msra.mxu0 %v1913_v8 }
 0xa8e   : > { %v1945_v35 = vpack.c.bf16 %v1943_v34, %v1941_v24  ;;  %v1946_v40 = vpack.c.bf16 %v1944_v33, %v1942_v27  ;;  %v1956_v25 = vpop.permute.xlu1 %1955  ;;  %v1973_v42 = vmul.f32 %v1966_v16, %v1957_v38  ;;  %v1974_v43 = vmul.f32 %v1970_v18, %v1959_v39 }
 0xa8f   : > { %v1958_v26 = vsel %vm1089_vm11, %v3142_v47, %v1956_v25  ;;  %v1960_v41 = vsel %vm1089_vm11, %v1956_v25, %v3142_v47 }
 0xa90   : > { %v1975_v44 = vmul.f32 %v1966_v16, %v1958_v26  ;;  %v1976_v7 = vmul.f32 %v1970_v18, %v1960_v41  ;;  %2023 = vmatprep.subr.bf16.mxu0 %v1946_v40 }
 0xa91   : > { %2024 = vmatpush1.bf16.msra.mxu0 %v1945_v35 }
 0xa92   : > { %v1977_v36 = vpack.c.bf16 %v1975_v44, %v1973_v42  ;;  %v1978_v45 = vpack.c.bf16 %v1976_v7, %v1974_v43 }
 0xa94   : > { %2025 = vmatprep.subr.bf16.mxu0 %v1978_v45 }
 0xa95   : > { %2026 = vmatpush1.bf16.msra.mxu0 %v1977_v36 }
 0xa98   : > { %2042 = vmatmul.mubr.bf16.vlgmr.msra.gmra.mrb[12].mxu0 %v2365_v46 }
 0xb6b   : > { %v2043_v28 = vpop.f32.mrb[12].mxu0 }
 0xb6c   : > { %v2045_v48 = vpop.f32.mrb[13].mxu0 }
 0xb6d   : > { %v2047_v49 = vpop.f32.mrb[14].mxu0  ;;  %v2050_v50 = vadd.f32 %v2045_v48, %v2043_v28 }
 0xb6e   : > { %v2048_v22 = vpop.f32.mrb[15].mxu0 }
 0xb6f   : > { %2051 = vadd.xlane.f32.xlu0 %v2050_v50 }
 0xbfc   : > { %v2052_v47 = vpop.xlane.xlu0 %2051 }
 0xbfd   : > { %2416 = vmatpush3.msra.mxu1 %v2052_v47 }
 0xbfe   : > { %2418 = vmatmul.mubr.msk.f32.vlgmr.msra.gmra.mrb[12].mxu1 %vm603_vm3, %v2494_v51  ;;  %2420 = vmatprep.subr.mxu1 %v2503_v0 }
 0xbff   : > { %2422 = vmatprep.mubr.msk.f32.mxu1 %vm2504_vm0, %v2503_v0 }
 0xcd1   : > { %v2119_v11 = vpop.f32.mrb[12].mxu1 }
 0xcd2   : > { %v2123_v52 = vmul.f32 0.00390625, %v2119_v11  ;;  %v2419_v54 = vpop.f32.mrb[13].mxu1 }
 0xcd4   : > { %2126 = vperm.xlu1 %2445, %v2123_v52  }
 0xd53   : > { %v2127_v55 = vpop.permute.xlu1 %2126 }
 0xd54   : > { %v2129_v56 = vsub.f32 %v2043_v28, %v2127_v55  ;;  %v2130_v57 = vsub.f32 %v2045_v48, %v2127_v55 }
 0xd56   : > { %v2131_v58 = vmul.f32 %v2129_v56, %v2129_v56  ;;  %v2132_v59 = vmul.f32 %v2130_v57, %v2130_v57 }
 0xd58   : > { %v2133_v53 = vadd.f32 %v2132_v59, %v2131_v58 }
 0xd5a   : > { %2134 = vadd.xlane.f32.xlu1 %v2133_v53 }
 0xd6b   : > { %2219 = vperm.xlu1 %2445, %v2216_v20  }
 0xde7   : > { %v2135_v29 = vpop.xlane.xlu1 %2134 }
 0xde8   : > { %2421 = vmatpush3.msra.mxu1 %v2135_v29 }
 0xde9   : > { %2423 = vmatmul.mubr.msk.f32.vlgmr.msra.gmra.mrb[14].mxu1 %vm603_vm3, %v2494_v51 }
 0xdeb   : > { %v2220_v1 = vpop.permute.xlu1 %2219 }
 0xebc   : > { %v2202_v0 = vpop.f32.mrb[14].mxu1 }
 0xebd   : > { %v2206_v21 = vmul.f32 0.00390625, %v2202_v0  ;;  %v2424_v12 = vpop.f32.mrb[15].mxu1 }
 0xebf   : > { %v2207_v60 = vadd.f32 1e-05, %v2206_v21 }
 0xec1   : > { %2484 = vrsqrt.f32 %v2207_v60 }
 0xecb   : > { %v2485_v30 = vpop.eup %2484 }
 0xecc   : > { %2211 = vperm.xlu0 %2444, %v2485_v30  }
 0xed0   : > { %2227 = vperm.xlu0 %2444, %v2224_v61  }
 0xf4b   : > { %v2212_v62 = vpop.permute.xlu0 %2211 }
 0xf4c   : > { %v2214_v2 = vmul.f32 %v2212_v62, %v2129_v56  ;;  %v2215_v63 = vmul.f32 %v2212_v62, %v2130_v57 }
 0xf4e   : > { %v2222_v17 = vmul.f32 %v2220_v1, %v2214_v2  ;;  %v2223_v19 = vmul.f32 %v2220_v1, %v2215_v63 }
 0xf4f   : > { %v2228_v23 = vpop.permute.xlu0 %2227 }
 0xf50   : > { %v2230_v3 = vadd.f32 %v2228_v23, %v2222_v17  ;;  %v2231_v31 = vadd.f32 %v2228_v23, %v2223_v19 }
 0xf52   : > { %v2232_v4 = vsub.f32 0.0, %v2230_v3  ;;  %v2233_v10 = vsub.f32 0.0, %v2231_v31 }
 0xf54   : > { %v2234_v5 = vmul.f32 1.442695, %v2232_v4  ;;  %v2236_v6 = vmul.f32 1.442695, %v2233_v10 }
 0xf56   : > { %2486 = vpow2.f32 %v2234_v5 }
 0xf57   : > { %2488 = vpow2.f32 %v2236_v6 }
 0xf60   : > { %v2487_v32 = vpop.eup %2486 }
 0xf61   : > { %v2489_v8 = vpop.eup %2488  ;;  %v2238_v9 = vadd.f32 1.0, %v2487_v32 }
 0xf62   : > { %v2239_v14 = vadd.f32 1.0, %v2489_v8 }
 0xf63   : > { %2490 = vrcp.f32 %v2238_v9 }
 0xf64   : > { %2492 = vrcp.f32 %v2239_v14 }
 0xf6d   : > { %v2491_v13 = vpop.eup %2490 }
 0xf6e   : > { %v2493_v15 = vpop.eup %2492  ;;  %v2242_v16 = vmul.f32 %v2491_v13, %v2230_v3 }
 0xf6f   : > { %v2243_v18 = vmul.f32 %v2493_v15, %v2231_v31 }
 0xf70   : > { %2244 = vst [vmem:[%s541_s25] sm:$0xff] %v2242_v16 }
 0xf71   : > { %2245 = vst [vmem:[%s541_s25 + $0x8] sm:$0xff] %v2243_v18 }
 0xf72 PF: > { %s26_s21 = sadd.s32 1, %s2501_s21  }
 0xf73   : > { %p23_p4 = scmp.ge.s32.totalorder %s26_s21, 4  }
 0xf75   :  { %25 = sbr.rel (!%p23_p4) target bundleno = 2 (0x2), region = 124 }

</bundles_post_ra>
